<compile_context>
chip_gen: v7x
topology: tpu7x:2x2x1
jax: 0.10.0
libtpu: 0.0.40
codegen_flags: <defaults>
</compile_context>

<pallas_src>
import functools

import jax
import jax.numpy as jnp
from jax import lax
from jax.experimental import pallas as pl
from jax.experimental.pallas import tpu as pltpu


# ----------------------------------------------------------------------------
# Pallas kernels
# ----------------------------------------------------------------------------
def encoder_kernel(src_ref, wx_ref, wh_ref, b_ref, fcw_ref, we_ref,
                   out_ref, eproj_ref, hpart_ref):
    """One RNN direction per grid step (d=0 forward, d=1 backward).

    Writes:
      out_ref[t]   = h_t                      (L, B, H)   per-direction outputs
      eproj_ref[t] = h_t @ attn_we[dir]       (L, B, Hd)  hoisted attention proj
      hpart_ref    = h_last @ enc_fcw[dir]    (B, Hd)     partial of encoder fc
    """
    d = pl.program_id(0)
    L, B, _ = src_ref.shape

    wx = wx_ref[...]
    wh = wh_ref[...]
    b = b_ref[...]
    we = we_ref[...]

    last = L - 1
    h0 = jnp.zeros((B, wh.shape[0]), jnp.float32)

    def body(i, h):
        t = jnp.where(d == 0, i, last - i)
        x = src_ref[t]                                            # (B, E)
        h_new = jnp.tanh(
            jnp.dot(x, wx, preferred_element_type=jnp.float32)
            + jnp.dot(h, wh, preferred_element_type=jnp.float32)
            + b)
        out_ref[t] = h_new
        eproj_ref[t] = jnp.dot(h_new, we, preferred_element_type=jnp.float32)
        return h_new

    h_last = lax.fori_loop(0, L, body, h0)
    hpart_ref[...] = jnp.dot(h_last, fcw_ref[...],
                             preferred_element_type=jnp.float32)


def decoder_kernel(emb_ref, enc_ref, eproj_ref, hpart_ref, fcb_ref,
                   attn_wh_ref, attn_b_ref, attn_v_ref,
                   wi_e_ref, wi_wf_ref, wi_wb_ref, wh_g_ref, bi_ref, bh_ref,
                   wo_ref, ww_f_ref, ww_b_ref, we_o_ref, b_out_ref,
                   prob_ref, h_ref):
    """Fused decoder: one grid step per target position, hidden in VMEM scratch."""
    t = pl.program_id(0)
    Hd = attn_wh_ref.shape[0]

    # Encoder-final fc: hidden = tanh(h_fwd @ fc_f + h_bwd @ fc_b + fc_b_bias).
    @pl.when(t == 0)
    def _():
        h_ref[...] = jnp.tanh(hpart_ref[0] + hpart_ref[1] + fcb_ref[...])

    h = h_ref[...]                                                # (B, Hd)
    emb = emb_ref[...]                                            # (B, Edec)

    # ---- Bahdanau attention (softmax over src_len, axis 0) ----
    proj_h = jnp.dot(h, attn_wh_ref[...],
                     preferred_element_type=jnp.float32)          # (B, Hd)
    energy = jnp.tanh(eproj_ref[0] + eproj_ref[1] + proj_h + attn_b_ref[...])
    scores = jnp.sum(energy * attn_v_ref[...], axis=-1,
                     keepdims=True)                               # (L, B, 1)
    m = jnp.max(scores, axis=0, keepdims=True)
    e = jnp.exp(scores - m)
    a = e * pl.reciprocal(jnp.sum(e, axis=0, keepdims=True), approx=True)

    w_f = jnp.sum(a * enc_ref[0], axis=0)                         # (B, H)
    w_b = jnp.sum(a * enc_ref[1], axis=0)                         # (B, H)

    # ---- GRU cell (PyTorch gate order r, z, n), fused gate matmuls ----
    gi = (jnp.dot(emb, wi_e_ref[...], preferred_element_type=jnp.float32)
          + jnp.dot(w_f, wi_wf_ref[...], preferred_element_type=jnp.float32)
          + jnp.dot(w_b, wi_wb_ref[...], preferred_element_type=jnp.float32)
          + bi_ref[...])                                          # (B, 3Hd)
    gh = (jnp.dot(h, wh_g_ref[...], preferred_element_type=jnp.float32)
          + bh_ref[...])                                          # (B, 3Hd)
    r = jax.nn.sigmoid(gi[:, :Hd] + gh[:, :Hd])
    z = jax.nn.sigmoid(gi[:, Hd:2 * Hd] + gh[:, Hd:2 * Hd])
    n = jnp.tanh(gi[:, 2 * Hd:] + r * gh[:, 2 * Hd:])
    h_new = (1.0 - z) * n + z * h
    h_ref[...] = h_new

    # ---- fc_out(cat(output, weighted, embedded)) + softmax (lane-dense Vp) ----
    logits = (jnp.dot(h_new, wo_ref[...], preferred_element_type=jnp.float32)
              + jnp.dot(w_f, ww_f_ref[...], preferred_element_type=jnp.float32)
              + jnp.dot(w_b, ww_b_ref[...], preferred_element_type=jnp.float32)
              + jnp.dot(emb, we_o_ref[...], preferred_element_type=jnp.float32)
              + b_out_ref[...])                                   # (B, Vp)
    lm = jnp.max(logits, axis=-1, keepdims=True)
    le = jnp.exp(logits - lm)
    prob_ref[...] = le * pl.reciprocal(jnp.sum(le, axis=-1, keepdims=True),
                                       approx=True)


# ----------------------------------------------------------------------------
# Wrappers
# ----------------------------------------------------------------------------
def encoder_forward(src, p):
    L, B, E = src.shape
    H = p["enc_wh"].shape[2]
    Hd = p["enc_fcw_split"].shape[2]
    return pl.pallas_call(
        encoder_kernel,
        grid=(2,),
        out_shape=(
            jax.ShapeDtypeStruct((2, L, B, H), jnp.float32),   # enc outputs
            jax.ShapeDtypeStruct((2, L, B, Hd), jnp.float32),  # attn enc proj
            jax.ShapeDtypeStruct((2, B, Hd), jnp.float32),     # fc partials
        ),
        in_specs=[
            pl.BlockSpec((L, B, E), lambda d: (0, 0, 0)),
            pl.BlockSpec((None, E, H), lambda d: (d, 0, 0)),
            pl.BlockSpec((None, H, H), lambda d: (d, 0, 0)),
            pl.BlockSpec((None, 1, H), lambda d: (d, 0, 0)),
            pl.BlockSpec((None, H, Hd), lambda d: (d, 0, 0)),
            pl.BlockSpec((None, H, Hd), lambda d: (d, 0, 0)),
        ],
        out_specs=(
            pl.BlockSpec((None, L, B, H), lambda d: (d, 0, 0, 0)),
            pl.BlockSpec((None, L, B, Hd), lambda d: (d, 0, 0, 0)),
            pl.BlockSpec((None, B, Hd), lambda d: (d, 0, 0)),
        ),
        compiler_params=pltpu.CompilerParams(
            dimension_semantics=("parallel",)),
    )(src, p["enc_wx"], p["enc_wh"], p["enc_b"],
      p["enc_fcw_split"], p["attn_we_split"])


def decoder_forward(emb_all, enc_out, eproj, hpart, p):
    T, B, Edec = emb_all.shape
    _, L, _, H = enc_out.shape
    Hd = p["attn_wh"].shape[0]
    Vp = p["out_wo"].shape[1]
    G = 3 * Hd

    def const(shape):
        return pl.BlockSpec(shape, lambda t, _n=len(shape): (0,) * _n)

    return pl.pallas_call(
        decoder_kernel,
        grid=(T,),
        out_shape=jax.ShapeDtypeStruct((T, B, Vp), jnp.float32),
        in_specs=[
            pl.BlockSpec((None, B, Edec), lambda t: (t, 0, 0)),   # per-step emb
            const((2, L, B, H)),     # encoder outputs (grid-invariant)
            const((2, L, B, Hd)),    # precomputed attention enc projection
            const((2, B, Hd)),       # encoder fc partials
            const((1, Hd)),          # enc_fcb
            const((Hd, Hd)),         # attn_wh
            const((1, Hd)),          # attn_b
            const((1, Hd)),          # attn_v
            const((Edec, G)),        # gru_wi_e
            const((H, G)),           # gru_wi_wf
            const((H, G)),           # gru_wi_wb
            const((Hd, G)),          # gru_wh
            const((1, G)),           # gru_bi
            const((1, G)),           # gru_bh
            const((Hd, Vp)),         # out_wo
            const((H, Vp)),          # out_ww_f
            const((H, Vp)),          # out_ww_b
            const((Edec, Vp)),       # out_we
            const((1, Vp)),          # out_b (padded with -1e30)
        ],
        out_specs=pl.BlockSpec((None, B, Vp), lambda t: (t, 0, 0)),
        scratch_shapes=[pltpu.VMEM((B, Hd), jnp.float32)],        # hidden state
        compiler_params=pltpu.CompilerParams(
            dimension_semantics=("arbitrary",)),
    )(emb_all, enc_out, eproj, hpart, p["enc_fcb"],
      p["attn_wh"], p["attn_b"], p["attn_v"],
      p["gru_wi_e"], p["gru_wi_wf"], p["gru_wi_wb"], p["gru_wh"],
      p["gru_bi"], p["gru_bh"],
      p["out_wo"], p["out_ww_f"], p["out_ww_b"], p["out_we"], p["out_b_pad"])


@functools.partial(jax.jit, static_argnames=("vocab",))
def seq2seq_forward(src, trg, kp, *, vocab):
    """src: (src_len, batch, img_channel) f32; trg: (batch, trg_len) i32.
    Returns (batch, trg_len, vocab) softmax probabilities."""
    enc_out, eproj, hpart = encoder_forward(src, kp)
    trg_tm = jnp.transpose(trg, (1, 0))                           # (T, B)
    # Embedding gather is glue (table lookup), done in plain JAX:
    emb_all = jnp.take(kp["emb_table"], trg_tm, axis=0)           # (T, B, Edec)
    probs = decoder_forward(emb_all, enc_out, eproj, hpart, kp)   # (T, B, Vp)
    return jnp.transpose(probs[:, :, :vocab], (1, 0, 2))          # (B, T, V)


# ----------------------------------------------------------------------------
# Parameters: logical init (used by the reference) + kernel-layout preparation
# ----------------------------------------------------------------------------
def init_params(key, vocab, enc_hid, dec_hid, img_ch, dec_emb):
    keys = iter(jax.random.split(key, 32))

    def u(fan_in, shape):
        s = 1.0 / float(fan_in) ** 0.5
        return jax.random.uniform(next(keys), shape, jnp.float32, -s, s)

    H, Hd, E, Edec, V = enc_hid, dec_hid, img_ch, dec_emb, vocab
    p = {}
    # Encoder: bidirectional tanh RNN, direction-stacked, weights (in, out).
    p["enc_wx"] = u(E, (2, E, H))
    p["enc_wh"] = u(H, (2, H, H))
    p["enc_b"] = u(H, (2, 1, H))
    p["enc_fcw"] = u(2 * H, (2 * H, Hd))
    p["enc_fcb"] = u(2 * H, (1, Hd))
    # Attention: Linear(2H+Hd, Hd) split into hidden / encoder parts, plus v.
    p["attn_wh"] = u(2 * H + Hd, (Hd, Hd))
    p["attn_we"] = u(2 * H + Hd, (2 * H, Hd))
    p["attn_b"] = u(2 * H + Hd, (1, Hd))
    p["attn_v"] = u(Hd, (1, Hd))
    # Decoder embedding table.
    p["emb_table"] = jax.random.normal(next(keys), (V, Edec), jnp.float32)
    # Decoder GRU: fused gates (order r, z, n), input = cat(emb, weighted).
    Din = Edec + 2 * H
    p["gru_wi"] = u(Hd, (Din, 3 * Hd))
    p["gru_wh"] = u(Hd, (Hd, 3 * Hd))
    p["gru_bi"] = u(Hd, (1, 3 * Hd))
    p["gru_bh"] = u(Hd, (1, 3 * Hd))
    # fc_out: Linear(Hd + 2H + Edec, V), input order (output, weighted, embedded).
    Dout = Hd + 2 * H + Edec
    p["out_w"] = u(Dout, (Dout, V))
    p["out_b"] = u(Dout, (1, V))
    return p


def prepare_params(p, vocab):
    """Split / fuse / pad logical params into the kernel layout."""
    H = p["enc_wh"].shape[1]
    Hd = p["attn_wh"].shape[0]
    Edec = p["emb_table"].shape[1]
    V = vocab
    Vp = ((V + 127) // 128) * 128 if V > 128 else 128

    def pad_v(w):
        return jnp.pad(w, ((0, 0), (0, Vp - V)))

    kp = dict(p)
    kp["enc_fcw_split"] = jnp.stack([p["enc_fcw"][:H], p["enc_fcw"][H:]], axis=0)
    kp["attn_we_split"] = jnp.stack([p["attn_we"][:H], p["attn_we"][H:]], axis=0)
    kp["gru_wi_e"] = p["gru_wi"][:Edec]
    kp["gru_wi_wf"] = p["gru_wi"][Edec:Edec + H]
    kp["gru_wi_wb"] = p["gru_wi"][Edec + H:]
    kp["out_wo"] = pad_v(p["out_w"][:Hd])
    kp["out_ww_f"] = pad_v(p["out_w"][Hd:Hd + H])
    kp["out_ww_b"] = pad_v(p["out_w"][Hd + H:Hd + 2 * H])
    kp["out_we"] = pad_v(p["out_w"][Hd + 2 * H:])
    # Padded vocab lanes get a huge negative bias so softmax assigns ~0 there.
    kp["out_b_pad"] = jnp.concatenate(
        [p["out_b"], jnp.full((1, Vp - V), -1e30, jnp.float32)], axis=1)
    return kp


# ----------------------------------------------------------------------------
# Pure-JAX reference (same math, for verification)
# ----------------------------------------------------------------------------
def reference_forward(src, trg, p):
    L, B, _ = src.shape
    H = p["enc_wh"].shape[1]
    Hd = p["attn_wh"].shape[0]

    def rnn_dir(d, reverse):
        wx, wh, b = p["enc_wx"][d], p["enc_wh"][d], p["enc_b"][d]

        def step(h, x):
            h_new = jnp.tanh(x @ wx + h @ wh + b[0])
            return h_new, h_new

        xs = src[::-1] if reverse else src
        h_last, hs = lax.scan(step, jnp.zeros((B, H), jnp.float32), xs)
        if reverse:
            hs = hs[::-1]
        return hs, h_last

    outf, hf = rnn_dir(0, False)
    outb, hb = rnn_dir(1, True)
    enc_out = jnp.concatenate([outf, outb], axis=-1)              # (L, B, 2H)
    h = jnp.tanh(jnp.concatenate([hf, hb], axis=1) @ p["enc_fcw"]
                 + p["enc_fcb"][0])
    enc_bLE = jnp.transpose(enc_out, (1, 0, 2))                   # (B, L, 2H)

    trg_tm = trg.T
    outs = []
    for t in range(trg_tm.shape[0]):
        emb = p["emb_table"][trg_tm[t]]                           # (B, Edec)
        energy = jnp.tanh(jnp.einsum('ble,eh->blh', enc_bLE, p["attn_we"])
                          + (h @ p["attn_wh"])[:, None, :] + p["attn_b"][0])
        scores = jnp.einsum('blh,h->bl', energy, p["attn_v"][0])
        a = jax.nn.softmax(scores, axis=-1)
        weighted = jnp.einsum('bl,ble->be', a, enc_bLE)
        x = jnp.concatenate([emb, weighted], axis=1)
        gi = x @ p["gru_wi"] + p["gru_bi"][0]
        gh = h @ p["gru_wh"] + p["gru_bh"][0]
        r = jax.nn.sigmoid(gi[:, :Hd] + gh[:, :Hd])
        z = jax.nn.sigmoid(gi[:, Hd:2 * Hd] + gh[:, Hd:2 * Hd])
        n = jnp.tanh(gi[:, 2 * Hd:] + r * gh[:, 2 * Hd:])
        h = (1.0 - z) * n + z * h
        cat = jnp.concatenate([h, weighted, emb], axis=1)
        logits = cat @ p["out_w"] + p["out_b"][0]
        outs.append(jax.nn.softmax(logits, axis=-1))
    return jnp.stack(outs, axis=1)                                # (B, T, V)


# ----------------------------------------------------------------------------
if __name__ == "__main__":
    vocab_size, encoder_hidden, decoder_hidden = 24, 16, 32
    img_channel, decoder_embedded = 8, 8
    src_len, batch, trg_len = 8, 2, 6

    key = jax.random.PRNGKey(0)
    kparam_key, ks, kt = jax.random.split(key, 3)
    params = init_params(kparam_key, vocab_size, encoder_hidden, decoder_hidden,
                         img_channel, decoder_embedded)
    kparams = prepare_params(params, vocab_size)

    src = jax.random.normal(ks, (src_len, batch, img_channel), jnp.float32)
    trg = jax.random.randint(kt, (batch, trg_len), 0, vocab_size, jnp.int32)

    out = seq2seq_forward(src, trg, kparams, vocab=vocab_size)
    out = jax.block_until_ready(out)

    ref = reference_forward(src, trg, params)
    assert out.shape == (batch, trg_len, vocab_size), out.shape
    assert bool(jnp.all(jnp.isfinite(out)))
    err = float(jnp.max(jnp.abs(out - ref)))
    assert err < 2e-2, err
    print("KERNEL_OK")
</pallas_src>

<mosaic_0001>
module attributes {stable_mosaic.version = 11 : i64} {
  func.func @encoder_kernel(%arg0: i32, %arg1: memref<8x2x8xf32, #tpu.memory_space<vmem>>, %arg2: memref<1x8x16xf32, #tpu.memory_space<vmem>>, %arg3: memref<1x16x16xf32, #tpu.memory_space<vmem>>, %arg4: memref<1x1x16xf32, #tpu.memory_space<vmem>>, %arg5: memref<1x16x32xf32, #tpu.memory_space<vmem>>, %arg6: memref<1x16x32xf32, #tpu.memory_space<vmem>>, %arg7: memref<1x8x2x16xf32, #tpu.memory_space<vmem>>, %arg8: memref<1x8x2x32xf32, #tpu.memory_space<vmem>>, %arg9: memref<1x2x32xf32, #tpu.memory_space<vmem>>) attributes {dimension_semantics = [#tpu.dimension_semantics<parallel>], iteration_bounds = array<i64: 2>, scalar_prefetch = 0 : i64, scratch_operands = 0 : i64, tpu.core_type = #tpu.core_type<tc>, window_params = [{pipeline_mode = #tpu.pipeline_mode<synchronous>, transform_indices = @transform_0, window_bounds = array<i64: 8, 2, 8>}, {transform_indices = @transform_1, window_bounds = array<i64: 1, 8, 16>}, {transform_indices = @transform_2, window_bounds = array<i64: 1, 16, 16>}, {transform_indices = @transform_3, window_bounds = array<i64: 1, 1, 16>}, {transform_indices = @transform_4, window_bounds = array<i64: 1, 16, 32>}, {transform_indices = @transform_5, window_bounds = array<i64: 1, 16, 32>}, {transform_indices = @transform_6, window_bounds = array<i64: 1, 8, 2, 16>}, {transform_indices = @transform_7, window_bounds = array<i64: 1, 8, 2, 32>}, {transform_indices = @transform_8, window_bounds = array<i64: 1, 2, 32>}]} {
    %c0 = arith.constant 0 : index
    %c0_0 = arith.constant 0 : index
    %c0_1 = arith.constant 0 : index
    %0 = vector.load %arg2[%c0, %c0_0, %c0_1] : memref<1x8x16xf32, #tpu.memory_space<vmem>>, vector<1x8x16xf32>
    %1 = vector.shape_cast %0 : vector<1x8x16xf32> to vector<8x16xf32>
    %c0_2 = arith.constant 0 : index
    %c0_3 = arith.constant 0 : index
    %c0_4 = arith.constant 0 : index
    %2 = vector.load %arg3[%c0_2, %c0_3, %c0_4] : memref<1x16x16xf32, #tpu.memory_space<vmem>>, vector<1x16x16xf32>
    %3 = vector.shape_cast %2 : vector<1x16x16xf32> to vector<16x16xf32>
    %c0_5 = arith.constant 0 : index
    %c0_6 = arith.constant 0 : index
    %c0_7 = arith.constant 0 : index
    %4 = vector.load %arg4[%c0_5, %c0_6, %c0_7] : memref<1x1x16xf32, #tpu.memory_space<vmem>>, vector<1x1x16xf32>
    %5 = vector.shape_cast %4 : vector<1x1x16xf32> to vector<1x16xf32>
    %c0_8 = arith.constant 0 : index
    %c0_9 = arith.constant 0 : index
    %c0_10 = arith.constant 0 : index
    %6 = vector.load %arg6[%c0_8, %c0_9, %c0_10] : memref<1x16x32xf32, #tpu.memory_space<vmem>>, vector<1x16x32xf32>
    %7 = vector.shape_cast %6 : vector<1x16x32xf32> to vector<16x32xf32>
    %cst = arith.constant 0.000000e+00 : f32
    %8 = vector.broadcast %cst : f32 to vector<2x16xf32>
    %c0_i32 = arith.constant 0 : i32
    %c8_i32 = arith.constant 8 : i32
    %9 = arith.addi %c0_i32, %c8_i32 : i32
    %c1_i32 = arith.constant 1 : i32
    %10 = scf.for %arg10 = %c0_i32 to %9 step %c1_i32 iter_args(%arg11 = %8) -> (vector<2x16xf32>)  : i32 {
      %c0_i32_19 = arith.constant 0 : i32
      %17 = arith.cmpi eq, %arg0, %c0_i32_19 : i32
      %c7_i32 = arith.constant 7 : i32
      %18 = arith.subi %c7_i32, %arg10 : i32
      %19 = arith.select %17, %arg10, %18 : i32
      %20 = arith.index_cast %19 : i32 to index
      %c0_20 = arith.constant 0 : index
      %c0_21 = arith.constant 0 : index
      %21 = vector.load %arg1[%20, %c0_20, %c0_21] : memref<8x2x8xf32, #tpu.memory_space<vmem>>, vector<1x2x8xf32>
      %22 = vector.shape_cast %21 : vector<1x2x8xf32> to vector<2x8xf32>
      %cst_22 = arith.constant dense<0.000000e+00> : vector<2x16xf32>
      %23 = tpu.matmul %22, %1, %cst_22 {dimension_numbers = #tpu.dot_dimension_numbers<[1], [0], [0], [1], [0, 0, 1, 1], [], []>} : vector<2x8xf32>, vector<8x16xf32>, vector<2x16xf32> -> vector<2x16xf32>
      %cst_23 = arith.constant dense<0.000000e+00> : vector<2x16xf32>
      %24 = tpu.matmul %arg11, %3, %cst_23 {dimension_numbers = #tpu.dot_dimension_numbers<[1], [0], [0], [1], [0, 0, 1, 1], [], []>} : vector<2x16xf32>, vector<16x16xf32>, vector<2x16xf32> -> vector<2x16xf32>
      %25 = arith.addf %23, %24 : vector<2x16xf32>
      %26 = vector.broadcast %5 : vector<1x16xf32> to vector<2x16xf32>
      %27 = arith.addf %25, %26 : vector<2x16xf32>
      %28 = math.tanh %27 : vector<2x16xf32>
      %c0_24 = arith.constant 0 : index
      %29 = arith.index_cast %19 : i32 to index
      %c0_25 = arith.constant 0 : index
      %c0_26 = arith.constant 0 : index
      %30 = vector.load %arg7[%c0_24, %29, %c0_25, %c0_26] : memref<1x8x2x16xf32, #tpu.memory_space<vmem>>, vector<1x1x2x16xf32>
      %31 = vector.shape_cast %30 : vector<1x1x2x16xf32> to vector<2x16xf32>
      %32 = vector.shape_cast %28 : vector<2x16xf32> to vector<1x1x2x16xf32>
      tpu.vector_store %arg7[%c0_24, %29, %c0_25, %c0_26], %32 {strides = array<i32>} : memref<1x8x2x16xf32, #tpu.memory_space<vmem>>, vector<1x1x2x16xf32>,
      %cst_27 = arith.constant dense<0.000000e+00> : vector<2x32xf32>
      %33 = tpu.matmul %28, %7, %cst_27 {dimension_numbers = #tpu.dot_dimension_numbers<[1], [0], [0], [1], [0, 0, 1, 1], [], []>} : vector<2x16xf32>, vector<16x32xf32>, vector<2x32xf32> -> vector<2x32xf32>
      %c0_28 = arith.constant 0 : index
      %34 = arith.index_cast %19 : i32 to index
      %c0_29 = arith.constant 0 : index
      %c0_30 = arith.constant 0 : index
      %35 = vector.load %arg8[%c0_28, %34, %c0_29, %c0_30] : memref<1x8x2x32xf32, #tpu.memory_space<vmem>>, vector<1x1x2x32xf32>
      %36 = vector.shape_cast %35 : vector<1x1x2x32xf32> to vector<2x32xf32>
      %37 = vector.shape_cast %33 : vector<2x32xf32> to vector<1x1x2x32xf32>
      tpu.vector_store %arg8[%c0_28, %34, %c0_29, %c0_30], %37 {strides = array<i32>} : memref<1x8x2x32xf32, #tpu.memory_space<vmem>>, vector<1x1x2x32xf32>,
      scf.yield %28 : vector<2x16xf32>
    }
    %c8_i32_11 = arith.constant 8 : i32
    %c0_12 = arith.constant 0 : index
    %c0_13 = arith.constant 0 : index
    %c0_14 = arith.constant 0 : index
    %11 = vector.load %arg5[%c0_12, %c0_13, %c0_14] : memref<1x16x32xf32, #tpu.memory_space<vmem>>, vector<1x16x32xf32>
    %12 = vector.shape_cast %11 : vector<1x16x32xf32> to vector<16x32xf32>
    %cst_15 = arith.constant dense<0.000000e+00> : vector<2x32xf32>
    %13 = tpu.matmul %10, %12, %cst_15 {dimension_numbers = #tpu.dot_dimension_numbers<[1], [0], [0], [1], [0, 0, 1, 1], [], []>} : vector<2x16xf32>, vector<16x32xf32>, vector<2x32xf32> -> vector<2x32xf32>
    %c0_16 = arith.constant 0 : index
    %c0_17 = arith.constant 0 : index
    %c0_18 = arith.constant 0 : index
    %14 = vector.load %arg9[%c0_16, %c0_17, %c0_18] : memref<1x2x32xf32, #tpu.memory_space<vmem>>, vector<1x2x32xf32>
    %15 = vector.shape_cast %14 : vector<1x2x32xf32> to vector<2x32xf32>
    %16 = vector.shape_cast %13 : vector<2x32xf32> to vector<1x2x32xf32>
    tpu.vector_store %arg9[%c0_16, %c0_17, %c0_18], %16 {strides = array<i32>} : memref<1x2x32xf32, #tpu.memory_space<vmem>>, vector<1x2x32xf32>,
    return
  }
  func.func @transform_0(%arg0: i32) -> (i32, i32, i32) {
    %c0_i32 = arith.constant 0 : i32
    %c0_i32_0 = arith.constant 0 : i32
    %c0_i32_1 = arith.constant 0 : i32
    %c0_i32_2 = arith.constant 0 : i32
    return %c0_i32, %c0_i32_0, %c0_i32_1 : i32, i32, i32
  }
  func.func @transform_1(%arg0: i32) -> (i32, i32, i32) {
    %c0_i32 = arith.constant 0 : i32
    %c0_i32_0 = arith.constant 0 : i32
    %c0_i32_1 = arith.constant 0 : i32
    return %arg0, %c0_i32, %c0_i32_0 : i32, i32, i32
  }
  func.func @transform_2(%arg0: i32) -> (i32, i32, i32) {
    %c0_i32 = arith.constant 0 : i32
    %c0_i32_0 = arith.constant 0 : i32
    %c0_i32_1 = arith.constant 0 : i32
    return %arg0, %c0_i32, %c0_i32_0 : i32, i32, i32
  }
  func.func @transform_3(%arg0: i32) -> (i32, i32, i32) {
    %c0_i32 = arith.constant 0 : i32
    %c0_i32_0 = arith.constant 0 : i32
    %c0_i32_1 = arith.constant 0 : i32
    return %arg0, %c0_i32, %c0_i32_0 : i32, i32, i32
  }
  func.func @transform_4(%arg0: i32) -> (i32, i32, i32) {
    %c0_i32 = arith.constant 0 : i32
    %c0_i32_0 = arith.constant 0 : i32
    %c0_i32_1 = arith.constant 0 : i32
    return %arg0, %c0_i32, %c0_i32_0 : i32, i32, i32
  }
  func.func @transform_5(%arg0: i32) -> (i32, i32, i32) {
    %c0_i32 = arith.constant 0 : i32
    %c0_i32_0 = arith.constant 0 : i32
    %c0_i32_1 = arith.constant 0 : i32
    return %arg0, %c0_i32, %c0_i32_0 : i32, i32, i32
  }
  func.func @transform_6(%arg0: i32) -> (i32, i32, i32, i32) {
    %c0_i32 = arith.constant 0 : i32
    %c0_i32_0 = arith.constant 0 : i32
    %c0_i32_1 = arith.constant 0 : i32
    %c0_i32_2 = arith.constant 0 : i32
    return %arg0, %c0_i32, %c0_i32_0, %c0_i32_1 : i32, i32, i32, i32
  }
  func.func @transform_7(%arg0: i32) -> (i32, i32, i32, i32) {
    %c0_i32 = arith.constant 0 : i32
    %c0_i32_0 = arith.constant 0 : i32
    %c0_i32_1 = arith.constant 0 : i32
    %c0_i32_2 = arith.constant 0 : i32
    return %arg0, %c0_i32, %c0_i32_0, %c0_i32_1 : i32, i32, i32, i32
  }
  func.func @transform_8(%arg0: i32) -> (i32, i32, i32) {
    %c0_i32 = arith.constant 0 : i32
    %c0_i32_0 = arith.constant 0 : i32
    %c0_i32_1 = arith.constant 0 : i32
    return %arg0, %c0_i32, %c0_i32_0 : i32, i32, i32
  }
}

module attributes {stable_mosaic.version = 11 : i64} {
  func.func @decoder_kernel(%arg0: i32, %arg1: memref<1x2x8xf32, #tpu.memory_space<vmem>>, %arg2: memref<2x8x2x16xf32, #tpu.memory_space<vmem>>, %arg3: memref<2x8x2x32xf32, #tpu.memory_space<vmem>>, %arg4: memref<2x2x32xf32, #tpu.memory_space<vmem>>, %arg5: memref<1x32xf32, #tpu.memory_space<vmem>>, %arg6: memref<32x32xf32, #tpu.memory_space<vmem>>, %arg7: memref<1x32xf32, #tpu.memory_space<vmem>>, %arg8: memref<1x32xf32, #tpu.memory_space<vmem>>, %arg9: memref<8x96xf32, #tpu.memory_space<vmem>>, %arg10: memref<16x96xf32, #tpu.memory_space<vmem>>, %arg11: memref<16x96xf32, #tpu.memory_space<vmem>>, %arg12: memref<32x96xf32, #tpu.memory_space<vmem>>, %arg13: memref<1x96xf32, #tpu.memory_space<vmem>>, %arg14: memref<1x96xf32, #tpu.memory_space<vmem>>, %arg15: memref<32x128xf32, #tpu.memory_space<vmem>>, %arg16: memref<16x128xf32, #tpu.memory_space<vmem>>, %arg17: memref<16x128xf32, #tpu.memory_space<vmem>>, %arg18: memref<8x128xf32, #tpu.memory_space<vmem>>, %arg19: memref<1x128xf32, #tpu.memory_space<vmem>>, %arg20: memref<1x2x128xf32, #tpu.memory_space<vmem>>, %arg21: memref<2x32xf32, #tpu.memory_space<vmem>>) attributes {dimension_semantics = [#tpu.dimension_semantics<arbitrary>], iteration_bounds = array<i64: 6>, scalar_prefetch = 0 : i64, scratch_operands = 1 : i64, tpu.core_type = #tpu.core_type<tc>, window_params = [{transform_indices = @transform_0, window_bounds = array<i64: 1, 2, 8>}, {pipeline_mode = #tpu.pipeline_mode<synchronous>, transform_indices = @transform_1, window_bounds = array<i64: 2, 8, 2, 16>}, {pipeline_mode = #tpu.pipeline_mode<synchronous>, transform_indices = @transform_2, window_bounds = array<i64: 2, 8, 2, 32>}, {pipeline_mode = #tpu.pipeline_mode<synchronous>, transform_indices = @transform_3, window_bounds = array<i64: 2, 2, 32>}, {pipeline_mode = #tpu.pipeline_mode<synchronous>, transform_indices = @transform_4, window_bounds = array<i64: 1, 32>}, {pipeline_mode = #tpu.pipeline_mode<synchronous>, transform_indices = @transform_5, window_bounds = array<i64: 32, 32>}, {pipeline_mode = #tpu.pipeline_mode<synchronous>, transform_indices = @transform_6, window_bounds = array<i64: 1, 32>}, {pipeline_mode = #tpu.pipeline_mode<synchronous>, transform_indices = @transform_7, window_bounds = array<i64: 1, 32>}, {pipeline_mode = #tpu.pipeline_mode<synchronous>, transform_indices = @transform_8, window_bounds = array<i64: 8, 96>}, {pipeline_mode = #tpu.pipeline_mode<synchronous>, transform_indices = @transform_9, window_bounds = array<i64: 16, 96>}, {pipeline_mode = #tpu.pipeline_mode<synchronous>, transform_indices = @transform_10, window_bounds = array<i64: 16, 96>}, {pipeline_mode = #tpu.pipeline_mode<synchronous>, transform_indices = @transform_11, window_bounds = array<i64: 32, 96>}, {pipeline_mode = #tpu.pipeline_mode<synchronous>, transform_indices = @transform_12, window_bounds = array<i64: 1, 96>}, {pipeline_mode = #tpu.pipeline_mode<synchronous>, transform_indices = @transform_13, window_bounds = array<i64: 1, 96>}, {pipeline_mode = #tpu.pipeline_mode<synchronous>, transform_indices = @transform_14, window_bounds = array<i64: 32, 128>}, {pipeline_mode = #tpu.pipeline_mode<synchronous>, transform_indices = @transform_15, window_bounds = array<i64: 16, 128>}, {pipeline_mode = #tpu.pipeline_mode<synchronous>, transform_indices = @transform_16, window_bounds = array<i64: 16, 128>}, {pipeline_mode = #tpu.pipeline_mode<synchronous>, transform_indices = @transform_17, window_bounds = array<i64: 8, 128>}, {pipeline_mode = #tpu.pipeline_mode<synchronous>, transform_indices = @transform_18, window_bounds = array<i64: 1, 128>}, {transform_indices = @transform_19, window_bounds = array<i64: 1, 2, 128>}]} {
    %c0_i32 = arith.constant 0 : i32
    %0 = arith.cmpi eq, %arg0, %c0_i32 : i32
    %1 = arith.extui %0 : i1 to i32
    %c0_i32_0 = arith.constant 0 : i32
    %2 = arith.cmpi ne, %1, %c0_i32_0 : i32
    scf.if %2 {
      %c0_71 = arith.constant 0 : index
      %c0_72 = arith.constant 0 : index
      %c0_73 = arith.constant 0 : index
      %117 = vector.load %arg4[%c0_71, %c0_72, %c0_73] : memref<2x2x32xf32, #tpu.memory_space<vmem>>, vector<1x2x32xf32>
      %118 = vector.shape_cast %117 : vector<1x2x32xf32> to vector<2x32xf32>
      %c1_74 = arith.constant 1 : index
      %c0_75 = arith.constant 0 : index
      %c0_76 = arith.constant 0 : index
      %119 = vector.load %arg4[%c1_74, %c0_75, %c0_76] : memref<2x2x32xf32, #tpu.memory_space<vmem>>, vector<1x2x32xf32>
      %120 = vector.shape_cast %119 : vector<1x2x32xf32> to vector<2x32xf32>
      %121 = arith.addf %118, %120 : vector<2x32xf32>
      %c0_77 = arith.constant 0 : index
      %c0_78 = arith.constant 0 : index
      %122 = vector.load %arg5[%c0_77, %c0_78] : memref<1x32xf32, #tpu.memory_space<vmem>>, vector<1x32xf32>
      %123 = vector.broadcast %122 : vector<1x32xf32> to vector<2x32xf32>
      %124 = arith.addf %121, %123 : vector<2x32xf32>
      %125 = math.tanh %124 : vector<2x32xf32>
      %c0_79 = arith.constant 0 : index
      %c0_80 = arith.constant 0 : index
      %126 = vector.load %arg21[%c0_79, %c0_80] : memref<2x32xf32, #tpu.memory_space<vmem>>, vector<2x32xf32>
      tpu.vector_store %arg21[%c0_79, %c0_80], %125 {strides = array<i32>} : memref<2x32xf32, #tpu.memory_space<vmem>>, vector<2x32xf32>,
    } else {
    }
    %c0 = arith.constant 0 : index
    %c0_1 = arith.constant 0 : index
    %3 = vector.load %arg21[%c0, %c0_1] : memref<2x32xf32, #tpu.memory_space<vmem>>, vector<2x32xf32>
    %c0_2 = arith.constant 0 : index
    %c0_3 = arith.constant 0 : index
    %c0_4 = arith.constant 0 : index
    %4 = vector.load %arg1[%c0_2, %c0_3, %c0_4] : memref<1x2x8xf32, #tpu.memory_space<vmem>>, vector<1x2x8xf32>
    %5 = vector.shape_cast %4 : vector<1x2x8xf32> to vector<2x8xf32>
    %c0_5 = arith.constant 0 : index
    %c0_6 = arith.constant 0 : index
    %6 = vector.load %arg6[%c0_5, %c0_6] : memref<32x32xf32, #tpu.memory_space<vmem>>, vector<32x32xf32>
    %cst = arith.constant dense<0.000000e+00> : vector<2x32xf32>
    %7 = tpu.matmul %3, %6, %cst {dimension_numbers = #tpu.dot_dimension_numbers<[1], [0], [0], [1], [0, 0, 1, 1], [], []>} : vector<2x32xf32>, vector<32x32xf32>, vector<2x32xf32> -> vector<2x32xf32>
    %c0_7 = arith.constant 0 : index
    %c0_8 = arith.constant 0 : index
    %c0_9 = arith.constant 0 : index
    %c0_10 = arith.constant 0 : index
    %8 = vector.load %arg3[%c0_7, %c0_8, %c0_9, %c0_10] : memref<2x8x2x32xf32, #tpu.memory_space<vmem>>, vector<1x8x2x32xf32>
    %9 = vector.shape_cast %8 : vector<1x8x2x32xf32> to vector<8x2x32xf32>
    %c1 = arith.constant 1 : index
    %c0_11 = arith.constant 0 : index
    %c0_12 = arith.constant 0 : index
    %c0_13 = arith.constant 0 : index
    %10 = vector.load %arg3[%c1, %c0_11, %c0_12, %c0_13] : memref<2x8x2x32xf32, #tpu.memory_space<vmem>>, vector<1x8x2x32xf32>
    %11 = vector.shape_cast %10 : vector<1x8x2x32xf32> to vector<8x2x32xf32>
    %12 = arith.addf %9, %11 : vector<8x2x32xf32>
    %13 = vector.shape_cast %7 : vector<2x32xf32> to vector<1x2x32xf32>
    %14 = vector.broadcast %13 : vector<1x2x32xf32> to vector<8x2x32xf32>
    %15 = arith.addf %12, %14 : vector<8x2x32xf32>
    %c0_14 = arith.constant 0 : index
    %c0_15 = arith.constant 0 : index
    %16 = vector.load %arg7[%c0_14, %c0_15] : memref<1x32xf32, #tpu.memory_space<vmem>>, vector<1x32xf32>
    %17 = vector.shape_cast %16 : vector<1x32xf32> to vector<1x1x32xf32>
    %18 = vector.broadcast %17 : vector<1x1x32xf32> to vector<8x2x32xf32>
    %19 = arith.addf %15, %18 : vector<8x2x32xf32>
    %20 = math.tanh %19 : vector<8x2x32xf32>
    %c0_16 = arith.constant 0 : index
    %c0_17 = arith.constant 0 : index
    %21 = vector.load %arg8[%c0_16, %c0_17] : memref<1x32xf32, #tpu.memory_space<vmem>>, vector<1x32xf32>
    %22 = vector.shape_cast %21 : vector<1x32xf32> to vector<1x1x32xf32>
    %23 = vector.broadcast %22 : vector<1x1x32xf32> to vector<8x2x32xf32>
    %24 = arith.mulf %20, %23 : vector<8x2x32xf32>
    %cst_18 = arith.constant dense<0.000000e+00> : vector<8x2xf32>
    %25 = vector.multi_reduction <add>, %24, %cst_18 [2] : vector<8x2x32xf32> to vector<8x2xf32>
    %26 = vector.shape_cast %25 : vector<8x2xf32> to vector<8x2x1xf32>
    %cst_19 = arith.constant dense<0xFF800000> : vector<2x1xf32>
    %27 = vector.multi_reduction <maximumf>, %26, %cst_19 [0] : vector<8x2x1xf32> to vector<2x1xf32>
    %28 = vector.shape_cast %27 : vector<2x1xf32> to vector<1x2x1xf32>
    %29 = vector.broadcast %28 : vector<1x2x1xf32> to vector<8x2x1xf32>
    %30 = arith.subf %26, %29 : vector<8x2x1xf32>
    %31 = math.exp %30 : vector<8x2x1xf32>
    %cst_20 = arith.constant dense<0.000000e+00> : vector<2x1xf32>
    %32 = vector.multi_reduction <add>, %31, %cst_20 [0] : vector<8x2x1xf32> to vector<2x1xf32>
    %33 = vector.shape_cast %32 : vector<2x1xf32> to vector<1x2x1xf32>
    %34 = tpu.reciprocal %33 {approx = true} : vector<1x2x1xf32> -> vector<1x2x1xf32>
    %35 = vector.broadcast %34 : vector<1x2x1xf32> to vector<8x2x1xf32>
    %36 = arith.mulf %31, %35 : vector<8x2x1xf32>
    %c0_21 = arith.constant 0 : index
    %c0_22 = arith.constant 0 : index
    %c0_23 = arith.constant 0 : index
    %c0_24 = arith.constant 0 : index
    %37 = vector.load %arg2[%c0_21, %c0_22, %c0_23, %c0_24] : memref<2x8x2x16xf32, #tpu.memory_space<vmem>>, vector<1x8x2x16xf32>
    %38 = vector.shape_cast %37 : vector<1x8x2x16xf32> to vector<8x2x16xf32>
    %39 = vector.broadcast %36 : vector<8x2x1xf32> to vector<8x2x16xf32>
    %40 = arith.mulf %39, %38 : vector<8x2x16xf32>
    %cst_25 = arith.constant dense<0.000000e+00> : vector<2x16xf32>
    %41 = vector.multi_reduction <add>, %40, %cst_25 [0] : vector<8x2x16xf32> to vector<2x16xf32>
    %c1_26 = arith.constant 1 : index
    %c0_27 = arith.constant 0 : index
    %c0_28 = arith.constant 0 : index
    %c0_29 = arith.constant 0 : index
    %42 = vector.load %arg2[%c1_26, %c0_27, %c0_28, %c0_29] : memref<2x8x2x16xf32, #tpu.memory_space<vmem>>, vector<1x8x2x16xf32>
    %43 = vector.shape_cast %42 : vector<1x8x2x16xf32> to vector<8x2x16xf32>
    %44 = vector.broadcast %36 : vector<8x2x1xf32> to vector<8x2x16xf32>
    %45 = arith.mulf %44, %43 : vector<8x2x16xf32>
    %cst_30 = arith.constant dense<0.000000e+00> : vector<2x16xf32>
    %46 = vector.multi_reduction <add>, %45, %cst_30 [0] : vector<8x2x16xf32> to vector<2x16xf32>
    %c0_31 = arith.constant 0 : index
    %c0_32 = arith.constant 0 : index
    %47 = vector.load %arg9[%c0_31, %c0_32] : memref<8x96xf32, #tpu.memory_space<vmem>>, vector<8x96xf32>
    %cst_33 = arith.constant dense<0.000000e+00> : vector<2x96xf32>
    %48 = tpu.matmul %5, %47, %cst_33 {dimension_numbers = #tpu.dot_dimension_numbers<[1], [0], [0], [1], [0, 0, 1, 1], [], []>} : vector<2x8xf32>, vector<8x96xf32>, vector<2x96xf32> -> vector<2x96xf32>
    %c0_34 = arith.constant 0 : index
    %c0_35 = arith.constant 0 : index
    %49 = vector.load %arg10[%c0_34, %c0_35] : memref<16x96xf32, #tpu.memory_space<vmem>>, vector<16x96xf32>
    %cst_36 = arith.constant dense<0.000000e+00> : vector<2x96xf32>
    %50 = tpu.matmul %41, %49, %cst_36 {dimension_numbers = #tpu.dot_dimension_numbers<[1], [0], [0], [1], [0, 0, 1, 1], [], []>} : vector<2x16xf32>, vector<16x96xf32>, vector<2x96xf32> -> vector<2x96xf32>
    %51 = arith.addf %48, %50 : vector<2x96xf32>
    %c0_37 = arith.constant 0 : index
    %c0_38 = arith.constant 0 : index
    %52 = vector.load %arg11[%c0_37, %c0_38] : memref<16x96xf32, #tpu.memory_space<vmem>>, vector<16x96xf32>
    %cst_39 = arith.constant dense<0.000000e+00> : vector<2x96xf32>
    %53 = tpu.matmul %46, %52, %cst_39 {dimension_numbers = #tpu.dot_dimension_numbers<[1], [0], [0], [1], [0, 0, 1, 1], [], []>} : vector<2x16xf32>, vector<16x96xf32>, vector<2x96xf32> -> vector<2x96xf32>
    %54 = arith.addf %51, %53 : vector<2x96xf32>
    %c0_40 = arith.constant 0 : index
    %c0_41 = arith.constant 0 : index
    %55 = vector.load %arg13[%c0_40, %c0_41] : memref<1x96xf32, #tpu.memory_space<vmem>>, vector<1x96xf32>
    %56 = vector.broadcast %55 : vector<1x96xf32> to vector<2x96xf32>
    %57 = arith.addf %54, %56 : vector<2x96xf32>
    %c0_42 = arith.constant 0 : index
    %c0_43 = arith.constant 0 : index
    %58 = vector.load %arg12[%c0_42, %c0_43] : memref<32x96xf32, #tpu.memory_space<vmem>>, vector<32x96xf32>
    %cst_44 = arith.constant dense<0.000000e+00> : vector<2x96xf32>
    %59 = tpu.matmul %3, %58, %cst_44 {dimension_numbers = #tpu.dot_dimension_numbers<[1], [0], [0], [1], [0, 0, 1, 1], [], []>} : vector<2x32xf32>, vector<32x96xf32>, vector<2x96xf32> -> vector<2x96xf32>
    %c0_45 = arith.constant 0 : index
    %c0_46 = arith.constant 0 : index
    %60 = vector.load %arg14[%c0_45, %c0_46] : memref<1x96xf32, #tpu.memory_space<vmem>>, vector<1x96xf32>
    %61 = vector.broadcast %60 : vector<1x96xf32> to vector<2x96xf32>
    %62 = arith.addf %59, %61 : vector<2x96xf32>
    %63 = vector.extract_strided_slice %57 {offsets = [0, 0], sizes = [2, 32], strides = [1, 1]} : vector<2x96xf32> to vector<2x32xf32>
    %64 = vector.extract_strided_slice %62 {offsets = [0, 0], sizes = [2, 32], strides = [1, 1]} : vector<2x96xf32> to vector<2x32xf32>
    %65 = arith.addf %63, %64 : vector<2x32xf32>
    %66 = arith.negf %65 : vector<2x32xf32>
    %67 = math.exp %66 : vector<2x32xf32>
    %cst_47 = arith.constant 1.000000e+00 : f32
    %68 = vector.broadcast %cst_47 : f32 to vector<2x32xf32>
    %69 = arith.addf %68, %67 : vector<2x32xf32>
    %70 = arith.divf %68, %69 : vector<2x32xf32>
    %71 = vector.extract_strided_slice %57 {offsets = [0, 32], sizes = [2, 32], strides = [1, 1]} : vector<2x96xf32> to vector<2x32xf32>
    %72 = vector.extract_strided_slice %62 {offsets = [0, 32], sizes = [2, 32], strides = [1, 1]} : vector<2x96xf32> to vector<2x32xf32>
    %73 = arith.addf %71, %72 : vector<2x32xf32>
    %74 = arith.negf %73 : vector<2x32xf32>
    %75 = math.exp %74 : vector<2x32xf32>
    %cst_48 = arith.constant 1.000000e+00 : f32
    %76 = vector.broadcast %cst_48 : f32 to vector<2x32xf32>
    %77 = arith.addf %76, %75 : vector<2x32xf32>
    %78 = arith.divf %76, %77 : vector<2x32xf32>
    %79 = vector.extract_strided_slice %57 {offsets = [0, 64], sizes = [2, 32], strides = [1, 1]} : vector<2x96xf32> to vector<2x32xf32>
    %80 = vector.extract_strided_slice %62 {offsets = [0, 64], sizes = [2, 32], strides = [1, 1]} : vector<2x96xf32> to vector<2x32xf32>
    %81 = arith.mulf %70, %80 : vector<2x32xf32>
    %82 = arith.addf %79, %81 : vector<2x32xf32>
    %83 = math.tanh %82 : vector<2x32xf32>
    %cst_49 = arith.constant 1.000000e+00 : f32
    %84 = vector.broadcast %cst_49 : f32 to vector<2x32xf32>
    %85 = arith.subf %84, %78 : vector<2x32xf32>
    %86 = arith.mulf %85, %83 : vector<2x32xf32>
    %87 = arith.mulf %78, %3 : vector<2x32xf32>
    %88 = arith.addf %86, %87 : vector<2x32xf32>
    %c0_50 = arith.constant 0 : index
    %c0_51 = arith.constant 0 : index
    %89 = vector.load %arg21[%c0_50, %c0_51] : memref<2x32xf32, #tpu.memory_space<vmem>>, vector<2x32xf32>
    tpu.vector_store %arg21[%c0_50, %c0_51], %88 {strides = array<i32>} : memref<2x32xf32, #tpu.memory_space<vmem>>, vector<2x32xf32>,
    %c0_52 = arith.constant 0 : index
    %c0_53 = arith.constant 0 : index
    %90 = vector.load %arg15[%c0_52, %c0_53] : memref<32x128xf32, #tpu.memory_space<vmem>>, vector<32x128xf32>
    %cst_54 = arith.constant dense<0.000000e+00> : vector<2x128xf32>
    %91 = tpu.matmul %88, %90, %cst_54 {dimension_numbers = #tpu.dot_dimension_numbers<[1], [0], [0], [1], [0, 0, 1, 1], [], []>} : vector<2x32xf32>, vector<32x128xf32>, vector<2x128xf32> -> vector<2x128xf32>
    %c0_55 = arith.constant 0 : index
    %c0_56 = arith.constant 0 : index
    %92 = vector.load %arg16[%c0_55, %c0_56] : memref<16x128xf32, #tpu.memory_space<vmem>>, vector<16x128xf32>
    %cst_57 = arith.constant dense<0.000000e+00> : vector<2x128xf32>
    %93 = tpu.matmul %41, %92, %cst_57 {dimension_numbers = #tpu.dot_dimension_numbers<[1], [0], [0], [1], [0, 0, 1, 1], [], []>} : vector<2x16xf32>, vector<16x128xf32>, vector<2x128xf32> -> vector<2x128xf32>
    %94 = arith.addf %91, %93 : vector<2x128xf32>
    %c0_58 = arith.constant 0 : index
    %c0_59 = arith.constant 0 : index
    %95 = vector.load %arg17[%c0_58, %c0_59] : memref<16x128xf32, #tpu.memory_space<vmem>>, vector<16x128xf32>
    %cst_60 = arith.constant dense<0.000000e+00> : vector<2x128xf32>
    %96 = tpu.matmul %46, %95, %cst_60 {dimension_numbers = #tpu.dot_dimension_numbers<[1], [0], [0], [1], [0, 0, 1, 1], [], []>} : vector<2x16xf32>, vector<16x128xf32>, vector<2x128xf32> -> vector<2x128xf32>
    %97 = arith.addf %94, %96 : vector<2x128xf32>
    %c0_61 = arith.constant 0 : index
    %c0_62 = arith.constant 0 : index
    %98 = vector.load %arg18[%c0_61, %c0_62] : memref<8x128xf32, #tpu.memory_space<vmem>>, vector<8x128xf32>
    %cst_63 = arith.constant dense<0.000000e+00> : vector<2x128xf32>
    %99 = tpu.matmul %5, %98, %cst_63 {dimension_numbers = #tpu.dot_dimension_numbers<[1], [0], [0], [1], [0, 0, 1, 1], [], []>} : vector<2x8xf32>, vector<8x128xf32>, vector<2x128xf32> -> vector<2x128xf32>
    %100 = arith.addf %97, %99 : vector<2x128xf32>
    %c0_64 = arith.constant 0 : index
    %c0_65 = arith.constant 0 : index
    %101 = vector.load %arg19[%c0_64, %c0_65] : memref<1x128xf32, #tpu.memory_space<vmem>>, vector<1x128xf32>
    %102 = vector.broadcast %101 : vector<1x128xf32> to vector<2x128xf32>
    %103 = arith.addf %100, %102 : vector<2x128xf32>
    %cst_66 = arith.constant dense<0xFF800000> : vector<2xf32>
    %104 = vector.multi_reduction <maximumf>, %103, %cst_66 [1] : vector<2x128xf32> to vector<2xf32>
    %105 = vector.shape_cast %104 : vector<2xf32> to vector<2x1xf32>
    %106 = vector.broadcast %105 : vector<2x1xf32> to vector<2x128xf32>
    %107 = arith.subf %103, %106 : vector<2x128xf32>
    %108 = math.exp %107 : vector<2x128xf32>
    %cst_67 = arith.constant dense<0.000000e+00> : vector<2xf32>
    %109 = vector.multi_reduction <add>, %108, %cst_67 [1] : vector<2x128xf32> to vector<2xf32>
    %110 = vector.shape_cast %109 : vector<2xf32> to vector<2x1xf32>
    %111 = tpu.reciprocal %110 {approx = true} : vector<2x1xf32> -> vector<2x1xf32>
    %112 = vector.broadcast %111 : vector<2x1xf32> to vector<2x128xf32>
    %113 = arith.mulf %108, %112 : vector<2x128xf32>
    %c0_68 = arith.constant 0 : index
    %c0_69 = arith.constant 0 : index
    %c0_70 = arith.constant 0 : index
    %114 = vector.load %arg20[%c0_68, %c0_69, %c0_70] : memref<1x2x128xf32, #tpu.memory_space<vmem>>, vector<1x2x128xf32>
    %115 = vector.shape_cast %114 : vector<1x2x128xf32> to vector<2x128xf32>
    %116 = vector.shape_cast %113 : vector<2x128xf32> to vector<1x2x128xf32>
    tpu.vector_store %arg20[%c0_68, %c0_69, %c0_70], %116 {strides = array<i32>} : memref<1x2x128xf32, #tpu.memory_space<vmem>>, vector<1x2x128xf32>,
    return
  }
  func.func @transform_0(%arg0: i32) -> (i32, i32, i32) {
    %c0_i32 = arith.constant 0 : i32
    %c0_i32_0 = arith.constant 0 : i32
    %c0_i32_1 = arith.constant 0 : i32
    return %arg0, %c0_i32, %c0_i32_0 : i32, i32, i32
  }
  func.func @transform_1(%arg0: i32) -> (i32, i32, i32, i32) {
    %c0_i32 = arith.constant 0 : i32
    %c0_i32_0 = arith.constant 0 : i32
    %c0_i32_1 = arith.constant 0 : i32
    %c0_i32_2 = arith.constant 0 : i32
    %c0_i32_3 = arith.constant 0 : i32
    return %c0_i32, %c0_i32_0, %c0_i32_1, %c0_i32_2 : i32, i32, i32, i32
  }
  func.func @transform_2(%arg0: i32) -> (i32, i32, i32, i32) {
    %c0_i32 = arith.constant 0 : i32
    %c0_i32_0 = arith.constant 0 : i32
    %c0_i32_1 = arith.constant 0 : i32
    %c0_i32_2 = arith.constant 0 : i32
    %c0_i32_3 = arith.constant 0 : i32
    return %c0_i32, %c0_i32_0, %c0_i32_1, %c0_i32_2 : i32, i32, i32, i32
  }
  func.func @transform_3(%arg0: i32) -> (i32, i32, i32) {
    %c0_i32 = arith.constant 0 : i32
    %c0_i32_0 = arith.constant 0 : i32
    %c0_i32_1 = arith.constant 0 : i32
    %c0_i32_2 = arith.constant 0 : i32
    return %c0_i32, %c0_i32_0, %c0_i32_1 : i32, i32, i32
  }
  func.func @transform_4(%arg0: i32) -> (i32, i32) {
    %c0_i32 = arith.constant 0 : i32
    %c0_i32_0 = arith.constant 0 : i32
    %c0_i32_1 = arith.constant 0 : i32
    return %c0_i32, %c0_i32_0 : i32, i32
  }
  func.func @transform_5(%arg0: i32) -> (i32, i32) {
    %c0_i32 = arith.constant 0 : i32
    %c0_i32_0 = arith.constant 0 : i32
    %c0_i32_1 = arith.constant 0 : i32
    return %c0_i32, %c0_i32_0 : i32, i32
  }
  func.func @transform_6(%arg0: i32) -> (i32, i32) {
    %c0_i32 = arith.constant 0 : i32
    %c0_i32_0 = arith.constant 0 : i32
    %c0_i32_1 = arith.constant 0 : i32
    return %c0_i32, %c0_i32_0 : i32, i32
  }
  func.func @transform_7(%arg0: i32) -> (i32, i32) {
    %c0_i32 = arith.constant 0 : i32
    %c0_i32_0 = arith.constant 0 : i32
    %c0_i32_1 = arith.constant 0 : i32
    return %c0_i32, %c0_i32_0 : i32, i32
  }
  func.func @transform_8(%arg0: i32) -> (i32, i32) {
    %c0_i32 = arith.constant 0 : i32
    %c0_i32_0 = arith.constant 0 : i32
    %c0_i32_1 = arith.constant 0 : i32
    return %c0_i32, %c0_i32_0 : i32, i32
  }
  func.func @transform_9(%arg0: i32) -> (i32, i32) {
    %c0_i32 = arith.constant 0 : i32
    %c0_i32_0 = arith.constant 0 : i32
    %c0_i32_1 = arith.constant 0 : i32
    return %c0_i32, %c0_i32_0 : i32, i32
  }
  func.func @transform_10(%arg0: i32) -> (i32, i32) {
    %c0_i32 = arith.constant 0 : i32
    %c0_i32_0 = arith.constant 0 : i32
    %c0_i32_1 = arith.constant 0 : i32
    return %c0_i32, %c0_i32_0 : i32, i32
  }
  func.func @transform_11(%arg0: i32) -> (i32, i32) {
    %c0_i32 = arith.constant 0 : i32
    %c0_i32_0 = arith.constant 0 : i32
    %c0_i32_1 = arith.constant 0 : i32
    return %c0_i32, %c0_i32_0 : i32, i32
  }
  func.func @transform_12(%arg0: i32) -> (i32, i32) {
    %c0_i32 = arith.constant 0 : i32
    %c0_i32_0 = arith.constant 0 : i32
    %c0_i32_1 = arith.constant 0 : i32
    return %c0_i32, %c0_i32_0 : i32, i32
  }
  func.func @transform_13(%arg0: i32) -> (i32, i32) {
    %c0_i32 = arith.constant 0 : i32
    %c0_i32_0 = arith.constant 0 : i32
    %c0_i32_1 = arith.constant 0 : i32
    return %c0_i32, %c0_i32_0 : i32, i32
  }
  func.func @transform_14(%arg0: i32) -> (i32, i32) {
    %c0_i32 = arith.constant 0 : i32
    %c0_i32_0 = arith.constant 0 : i32
    %c0_i32_1 = arith.constant 0 : i32
    return %c0_i32, %c0_i32_0 : i32, i32
  }
  func.func @transform_15(%arg0: i32) -> (i32, i32) {
    %c0_i32 = arith.constant 0 : i32
    %c0_i32_0 = arith.constant 0 : i32
    %c0_i32_1 = arith.constant 0 : i32
    return %c0_i32, %c0_i32_0 : i32, i32
  }
  func.func @transform_16(%arg0: i32) -> (i32, i32) {
    %c0_i32 = arith.constant 0 : i32
    %c0_i32_0 = arith.constant 0 : i32
    %c0_i32_1 = arith.constant 0 : i32
    return %c0_i32, %c0_i32_0 : i32, i32
  }
  func.func @transform_17(%arg0: i32) -> (i32, i32) {
    %c0_i32 = arith.constant 0 : i32
    %c0_i32_0 = arith.constant 0 : i32
    %c0_i32_1 = arith.constant 0 : i32
    return %c0_i32, %c0_i32_0 : i32, i32
  }
  func.func @transform_18(%arg0: i32) -> (i32, i32) {
    %c0_i32 = arith.constant 0 : i32
    %c0_i32_0 = arith.constant 0 : i32
    %c0_i32_1 = arith.constant 0 : i32
    return %c0_i32, %c0_i32_0 : i32, i32
  }
  func.func @transform_19(%arg0: i32) -> (i32, i32, i32) {
    %c0_i32 = arith.constant 0 : i32
    %c0_i32_0 = arith.constant 0 : i32
    %c0_i32_1 = arith.constant 0 : i32
    return %arg0, %c0_i32, %c0_i32_0 : i32, i32, i32
  }
}

</mosaic_0001>

<bundles_post_ra>
// kernel: seq2seq_forward.2
= control target key start
LH: loop header
LB: loop body
LE: loop exit
PB: predicated region body
PF: predicated region fallthrough
CT: control target
= control target key end

     0   :  { %s1093_s27 = smov 0   ;;  %s1178_s0 = inlined_call_operand.vmem [shape: f32[8,2,8], index: 0, kind: input, shape index: {}]   ;;  %s1179_s1 = inlined_call_operand.vmem [shape: f32[2,8,16], index: 1, kind: input, shape index: {}]   ;;  %s1180_s2 = inlined_call_operand.vmem [shape: f32[2,16,16], index: 2, kind: input, shape index: {}]   ;;  %s1181_s3 = inlined_call_operand.vmem [shape: f32[2,1,16], index: 3, kind: input, shape index: {}]   ;;  %s1182_s4 = inlined_call_operand.vmem [shape: f32[2,16,32], index: 4, kind: input, shape index: {}]   ;;  %s1183_s5 = inlined_call_operand.vmem [shape: f32[2,16,32], index: 5, kind: input, shape index: {}]   ;;  %s1184_s6 = inlined_call_operand.vmem [shape: f32[2,8,2,16], index: 6, kind: output, shape index: {0}]   ;;  %s1185_s7 = inlined_call_operand.vmem [shape: f32[2,8,2,32], index: 7, kind: output, shape index: {1}]   ;;  %s1186_s8 = inlined_call_operand.vmem [shape: f32[2,2,32], index: 8, kind: output, shape index: {2}]  }
   0x1 LB: > { %s1099_s28 = sadd.s32 4294967295, %s1032_s27   ;;  %p914_p0 = scmp.ge.s32.totalorder %s1032_s27, 1  ;;  %s1032_s27 = sphi %s1093_s27, %s19_s27  }
   0x2   : > { %p304_p1 = scmp.lt.s32.totalorder %s1032_s27, 3 }
   0x4   : > { %p305_p2 = pnand %p914_p0, %p304_p1 }
   0x5   : > { %p364_p3 = scmp.lt.s32.totalorder (!%p305_p2), %s1099_s28, 1  ;;  %v1034_v6 = vmov (!%p305_p2), 0.0   ;;  %s1140_s17 = smov (!%p305_p2), 0  }
   0x6   : > { %308 = sbr.rel (%p305_p2) target bundleno = 468 (0x1d4), region = 44 }
   0xd   : > { %s365_s29 = scalar_select %p364_p3, %s1099_s28, 1 }
   0xf   : > { %s915_s30 = sshll.u32 %s365_s29, 3  ;;  %s1105_s9 = sshll.u32 %s365_s29, 4 }
  0x10   : > { %s367_s12 = scalar_lea.vmem %s1179_s1, %s915_s30  ;;  %s372_s15 = scalar_lea.vmem %s1180_s2, %s1105_s9 }
  0x11   : > { %s375_s18 = scalar_lea.vmem %s1181_s3, %s365_s29  ;;  %s1121_s21 = scalar_lea.vmem %s1182_s4, %s1105_s9  ;;  %v400_v0 = vld [vmem:[%s367_s12] sm:$0xff]  ;;  %v402_v2 = vld [vmem:[%s372_s15 + $0x8] sm:$0xff] }
  0x12   : > { %v401_v1 = vld [vmem:[%s372_s15] sm:$0xff]  ;;  %s385_s24 = scalar_lea.vmem %s1183_s5, %s1105_s9  ;;  %s390_s30 = scalar_lea.vmem %s1184_s6, %s1105_s9 }
  0x13   : > { %v930_v3 = vld [vmem:[%s375_s18] ss:$0 sm:$0xff]  ;;  %s395_s13 = scalar_lea.vmem %s1185_s7, %s1105_s9  ;;  %s926_s14 = sshll.u32 %s365_s29, 1  ;;  %v405_v5 = vld [vmem:[%s385_s24 + $0x8] sm:$0xff] }
  0x14   : > { %v404_v4 = vld [vmem:[%s385_s24] sm:$0xff]  ;;  %s1138_s15 = scalar_lea.vmem %s1186_s8, %s926_s14 }
  0x15 LB: >> { %v978_v7 = vpack.c.bf16 %v402_v2, %v401_v1  ;;  %p413_p4 = scmp.eq.s32.totalorder %s1099_s28, 0  ;;  %v1042_v8 = vmov 0.0|0.0   ;;  %vm1043_vm0 = vmmov 0   ;;  %v1044_v9 = vmov 0.0   ;;  %s414_s29 = ssub.s32 7, %s1040_s17  ;;  %s1040_s17 = sphi %s1140_s17, %s411_s17   ;;  %v1036_v6 = vphi %v1034_v6, %v1035_v6  }
  0x16   : >> { %977 = vmatprep.subr.bf16.mxu0 %v1042_v8  ;;  %955 = vmatprep.mubr.msk.f32.mxu0 %vm1043_vm0, %v1044_v9  ;;  %vm419_vm1 = vcmask 130048   ;;  %vm493_vm2 = vcmask 64512   ;;  %v981_v11 = vpack.c.bf16 %v405_v5, %v404_v4  ;;  %vm576_vm3 = vcmask 123904  }
  0x17   : >> { %979 = vmatpush3.bf16.msra.mxu0 %v978_v7  ;;  %958 = vmatprep.subr.mxu1 %v1044_v9  ;;  %s415_s18 = scalar_select %p413_p4, %s1040_s17, %s414_s29  ;;  %vm652_vm4 = vcmask 254976  }
  0x18   : >> { %959 = vmatpush3.msra.mxu1 %v400_v0  ;;  %960 = vmatprep.mubr.msk.f32.mxu1 %vm1043_vm0, %v1044_v9  ;;  %s411_s17 = sadd.s32 1, %s1040_s17  }
  0x19   : >> { %980 = vmatprep.subr.bf16.mxu1 %v1042_v8  ;;  %s927_s19 = sshll.u32 %s415_s18, 1  ;;  %p408_p5 = scmp.ge.s32.totalorder %s411_s17, 8  }
  0x1a   : >> { %956 = vmatmul.mubr.msk.f32.vlgmr.msra.gmra.mrb[0].mxu0 %vm419_vm1, %v1036_v6  ;;  %s417_s23 = scalar_lea.vmem %s1178_s0, %s927_s19  ;;  %s575_s26 = scalar_lea.vmem %s390_s30, %s927_s19  ;;  %v654_v21 = vld [vmem:[%s1121_s21] sm:$0xff] (%p408_p5)  ;;  %v655_v22 = vld [vmem:[%s1121_s21 + $0x8] sm:$0xff] (%p408_p5)  ;;  %v1045_v23 = vmov (%p408_p5), 0.0|0.0   ;;  %vm1046_vm5 = vmmov (%p408_p5), 0   ;;  %v1047_v25 = vmov (%p408_p5), 0.0  }
  0x1b   : >> { %v418_v10 = vld [vmem:[%s417_s23] sm:$0x3]  ;;  %s651_s14 = scalar_lea.vmem %s395_s13, %s927_s19  ;;  %983 = vmatprep.subr.bf16.mxu0 (%p408_p5), %v1045_v23  ;;  %v984_v24 = vpack.c.bf16 (%p408_p5), %v655_v22, %v654_v21  ;;  %974 = vmatprep.mubr.msk.f32.mxu0 (%p408_p5), %vm1046_vm5, %v1047_v25 }
  0x1c   : >> { %961 = vmatmul.mubr.msk.f32.vlgmr.msra.gmra.mrb[0].mxu1 %vm493_vm2, %v418_v10 }
  0x1d   : >> { %967 = vmatprep.mubr.msk.f32.mxu1 %vm1043_vm0, %v1044_v9  ;;  %982 = vmatpush3.bf16.msra.mxu1 %v981_v11 }
  0x1e   : > { %985 = vmatpush3.bf16.msra.mxu0 (%p408_p5), %v984_v24 }
  0xed   : >> { %v489_v12 = vpop.f32.mrb[0].mxu0 }
  0xee   : >> { %v957_v13 = vpop.f32.mrb[1].mxu0 }
  0xef   : >> { %v563_v14 = vpop.f32.mrb[0].mxu1 }
  0xf0   : >> { %v564_v15 = vadd.f32 %v563_v14, %v489_v12  ;;  %v962_v16 = vpop.f32.mrb[1].mxu1 }
  0xf2   : >> { %v573_v17 = vadd.f32 %v930_v3, %v564_v15 }
  0xf4   : >> { %1016 = vtanh.f32 %v573_v17 }
  0xfe   : >> { %v1017_v18 = vpop.eup %1016  }
  0xff   : >> { %577 = vst.msk [vmem:[%s575_s26] sm:$0x3] %vm576_vm3, %v1017_v18  ;;  %968 = vmatmul.mubr.msk.f32.vlgmr.msra.gmra.mrb[2].mxu1 %vm419_vm1, %v1017_v18  ;;  %v1035_v6 = vmov %v1017_v18   ;;  %975 = vmatmul.mubr.msk.f32.vlgmr.msra.gmra.mrb[0].mxu0 (%p408_p5), %vm419_vm1, %v1017_v18 }
 0x1cd   : > { %410 = sbr.rel (!%p408_p5) target bundleno = 21 (0x15), region = 120 }
 0x1d2   : >> { %v647_v19 = vpop.f32.mrb[2].mxu1  ;;  %v726_v26 = vpop.f32.mrb[0].mxu0 (%p408_p5) }
 0x1d3   : >> { %653 = vst.msk [vmem:[%s651_s14] sm:$0x3] %vm652_vm4, %v647_v19  ;;  %v969_v20 = vpop.f32.mrb[3].mxu1  ;;  %731 = vst.msk [vmem:[%s1138_s15] sm:$0x3] (%p408_p5), %vm652_vm4, %v726_v26  ;;  %v976_v27 = vpop.f32.mrb[1].mxu0 (%p408_p5) }
 0x1d4 PF: > { %s19_s27 = sadd.s32 1, %s1032_s27  }
 0x1d5   : > { %p16_p6 = scmp.ge.s32.totalorder %s19_s27, 4  }
 0x1d7   :  { %18 = sbr.rel (!%p16_p6) target bundleno = 1 (0x1), region = 131 }

// kernel: seq2seq_forward.3
= control target key start
LH: loop header
LB: loop body
LE: loop exit
PB: predicated region body
PF: predicated region fallthrough
CT: control target
= control target key end

     0   :  { %s2286_s0 = inlined_call_operand.vmem [shape: f32[6,2,8], index: 0, kind: input, shape index: {}]   ;;  %s2287_s1 = inlined_call_operand.vmem [shape: f32[2,8,2,16], index: 1, kind: input, shape index: {}]   ;;  %s2288_s2 = inlined_call_operand.vmem [shape: f32[2,8,2,32], index: 2, kind: input, shape index: {}]   ;;  %s2289_s3 = inlined_call_operand.vmem [shape: f32[2,2,32], index: 3, kind: input, shape index: {}]   ;;  %s2290_s4 = inlined_call_operand.vmem [shape: f32[1,32], index: 4, kind: input, shape index: {}]   ;;  %s2291_s5 = inlined_call_operand.vmem [shape: f32[32,32], index: 5, kind: input, shape index: {}]   ;;  %s2292_s6 = inlined_call_operand.vmem [shape: f32[1,32], index: 6, kind: input, shape index: {}]   ;;  %s2293_s7 = inlined_call_operand.vmem [shape: f32[1,32], index: 7, kind: input, shape index: {}]   ;;  %s2294_s8 = inlined_call_operand.vmem [shape: f32[8,96], index: 8, kind: input, shape index: {}]   ;;  %s2295_s9 = inlined_call_operand.vmem [shape: f32[16,96], index: 9, kind: input, shape index: {}]   ;;  %s2296_s10 = inlined_call_operand.vmem [shape: f32[16,96], index: 10, kind: input, shape index: {}]   ;;  %s2297_s11 = inlined_call_operand.vmem [shape: f32[32,96], index: 11, kind: input, shape index: {}]   ;;  %s2298_s12 = inlined_call_operand.vmem [shape: f32[1,96], index: 12, kind: input, shape index: {}]   ;;  %s2299_s13 = inlined_call_operand.vmem [shape: f32[1,96], index: 13, kind: input, shape index: {}]   ;;  %s2300_s14 = inlined_call_operand.vmem [shape: f32[32,128], index: 14, kind: input, shape index: {}]   ;;  %s2301_s15 = inlined_call_operand.vmem [shape: f32[16,128], index: 15, kind: input, shape index: {}]   ;;  %s2302_s16 = inlined_call_operand.vmem [shape: f32[16,128], index: 16, kind: input, shape index: {}]   ;;  %s2303_s17 = inlined_call_operand.vmem [shape: f32[8,128], index: 17, kind: input, shape index: {}]   ;;  %s2304_s18 = inlined_call_operand.vmem [shape: f32[1,128], index: 18, kind: input, shape index: {}]   ;;  %s2305_s19 = inlined_call_operand.vmem [shape: f32[6,2,128], index: 19, kind: output, shape index: {}]  }
   0x1   :  { %2310 = sst [smem:[#allocation4_spill]] %s2286_s0  ;;  %s1986_s0 = smov 0  }
   0x2   :  { %2311 = sst [smem:[#allocation5_spill]] %s2287_s1 }
   0x3   :  { %2312 = sst [smem:[#allocation6_spill]] %s2288_s2 }
   0x4   :  { %2313 = sst [smem:[#allocation7_spill]] %s2289_s3 }
   0x5   :  { %2314 = sst [smem:[#allocation8_spill]] %s2304_s18 }
   0x6 LB: > { %2315 = sst [smem:[#allocation3_spill]] %s1878_s0  ;;  %s1637_s30 = sadd.s32 4294967295, %s1878_s0   ;;  %s1878_s0 = sphi %s1986_s0, %s29_s0  }
   0x7   : > { %p1641_p0 = scmp.ge.s32.totalorder %s1878_s0, 1  ;;  %p536_p1 = scmp.lt.s32.totalorder %s1878_s0, 7 }
   0x9   : > { %p537_p2 = pnand %p1641_p0, %p536_p1 }
   0xa   : > { %p590_p3 = scmp.lt.s32.totalorder (!%p537_p2), %s1637_s30, 5  ;;  %s2316_s2 = sld [smem:[#allocation4_spill]] (!%p537_p2) }
   0xb   : > { %540 = sbr.rel (%p537_p2) target bundleno = 1749 (0x6d5), region = 96  ;;  %p1644_p4 = scmp.ne.s32.totalorder (!%p537_p2), %s1637_s30, 0 }
  0x12   : > { %s591_s20 = scalar_select %p590_p3, %s1637_s30, 5 }
  0x13   : > { %601 = sbr.rel (%p1644_p4) target bundleno = 42 (0x2a), region = 100  ;;  %s2317_s28 = sld [smem:[#allocation7_spill]] (!%p1644_p4)  ;;  %v1646_v2 = vld [vmem:[%s2290_s4] ss:$0 sm:$0xff] (!%p1644_p4)  ;;  %vm615_vm0 = vcmask (!%p1644_p4), 254976  }
  0x14   : > { %s1642_s21 = sshll.u32 %s591_s20, 1 }
  0x15   : > { %s1997_s23 = scalar_lea.vmem %s2316_s2, %s1642_s21  ;;  %s2002_s3 = scalar_lea.vmem %s2305_s19, %s1642_s21 }
  0x19   : > { %v602_v0 = vld [vmem:[%s2317_s28] sm:$0x3] (!%p1644_p4)  ;;  %v1645_v1 = vld [vmem:[%s2317_s28 + $0x2] sm:$0x3] (!%p1644_p4) }
  0x1a   : > { %v605_v3 = vadd.f32 %v1645_v1, %v602_v0 }
  0x1c   : > { %v613_v4 = vadd.f32 %v1646_v2, %v605_v3 }
  0x1e   : > { %1826 = vtanh.f32 %v613_v4 }
  0x28   : > { %v1827_v5 = vpop.eup %1826 }
  0x29   : > { %616 = vst.msk [vmem:[#allocation2] sm:$0x3] %vm615_vm0, %v1827_v5 }
  0x2a PF: > { %v619_v6 = vld [vmem:[%s2291_s5] sm:$0xff]  ;;  %v620_v7 = vld [vmem:[%s2291_s5 + $0x8] sm:$0xff]  ;;  %v621_v8 = vld [vmem:[%s2291_s5 + $0x10] sm:$0xff]  ;;  %v1880_v9 = vmov 0.0|0.0   ;;  %vm1881_vm1 = vmmov 0   ;;  %v1882_v12 = vmov 0.0  }
  0x2b   : > { %1782 = vmatprep.subr.bf16.mxu0 %v1880_v9  ;;  %v1783_v10 = vpack.c.bf16 %v620_v7, %v619_v6  ;;  %v622_v11 = vld [vmem:[%s2291_s5 + $0x18] sm:$0xff]  ;;  %1719 = vmatprep.mubr.msk.f32.mxu0 %vm1881_vm1, %v1882_v12  ;;  %vm623_vm2 = vcmask 261120   ;;  %s2318_s27 = sld [smem:[#allocation6_spill]]  ;;  %v1656_v38 = vld [vmem:[%s2292_s6] ss:$0 sm:$0xff]  ;;  %vm768_vm3 = vcmask 254976  }
  0x2c   : > { %1788 = vmatprep.subr.bf16.mxu1 %v1880_v9  ;;  %1726 = vmatprep.mubr.msk.f32.mxu1 %vm1881_vm1, %v1882_v12  ;;  %v1786_v13 = vpack.c.bf16 %v622_v11, %v621_v8  ;;  %v1657_v58 = vld [vmem:[%s2293_s7] ss:$0 sm:$0xff]  ;;  %vm793_vm4 = vcmask 1041408   ;;  %s2319_s18 = sld [smem:[#allocation5_spill]]  ;;  %vm873_vm5 = vcmask 123904   ;;  %vm924_vm6 = vcmask 130048  }
  0x2d   : > { %1784 = vmatpush3.bf16.msra.mxu0 %v1783_v10  ;;  %vm998_vm7 = vcmask 64512   ;;  %s1883_s30 = smov 64   ;;  %s1884_s20 = smov 96  }
  0x2e   : > { %1785 = vmatprep.subr.bf16.mxu0 %v1880_v9  ;;  %s2320_s2 = sld [smem:[#allocation8_spill]] }
  0x30   : > { %v2032_v14 = vld [vmem:[#allocation2] sm:$0x3] }
  0x31   : > { %1787 = vmatpush3.bf16.msra.mxu0 %v1786_v13  ;;  %v699_v15 = vld [vmem:[%s2318_s27 + $0x4] sm:$0x3]  ;;  %v1650_v16 = vld [vmem:[%s2318_s27 + $0x14] sm:$0x3]  ;;  %v697_v17 = vld [vmem:[%s2318_s27] sm:$0x3] }
  0x32   : > { %1791 = vmatprep.subr.bf16.mxu0 %v1880_v9  ;;  %v1648_v18 = vld [vmem:[%s2318_s27 + $0x10] sm:$0x3]  ;;  %v700_v19 = vld [vmem:[%s2318_s27 + $0x6] sm:$0x3]  ;;  %v1651_v20 = vld [vmem:[%s2318_s27 + $0x16] sm:$0x3]  ;;  %v716_v27 = vadd.f32 %v1650_v16, %v699_v15 }
  0x33   : > { %v698_v21 = vld [vmem:[%s2318_s27 + $0x2] sm:$0x3]  ;;  %v1649_v22 = vld [vmem:[%s2318_s27 + $0x12] sm:$0x3]  ;;  %v702_v23 = vld [vmem:[%s2318_s27 + $0xa] sm:$0x3]  ;;  %v714_v28 = vadd.f32 %v1648_v18, %v697_v17  ;;  %v717_v29 = vadd.f32 %v1651_v20, %v700_v19 }
  0x34   : > { %1720 = vmatmul.mubr.msk.f32.vlgmr.msra.gmra.mrb[0].mxu0 %vm623_vm2, %v2032_v14  ;;  %v1653_v24 = vld [vmem:[%s2318_s27 + $0x1a] sm:$0x3]  ;;  %v701_v25 = vld [vmem:[%s2318_s27 + $0x8] sm:$0x3]  ;;  %v1652_v26 = vld [vmem:[%s2318_s27 + $0x18] sm:$0x3]  ;;  %v715_v30 = vadd.f32 %v1649_v22, %v698_v21 }
  0x35   : > { %1738 = vmatprep.mubr.msk.f32.mxu0 %vm1881_vm1, %v1882_v12  ;;  %v704_v31 = vld [vmem:[%s2318_s27 + $0xe] sm:$0x3]  ;;  %v1655_v32 = vld [vmem:[%s2318_s27 + $0x1e] sm:$0x3]  ;;  %v719_v33 = vadd.f32 %v1653_v24, %v702_v23  ;;  %v718_v34 = vadd.f32 %v1652_v26, %v701_v25  ;;  %v703_v35 = vld [vmem:[%s2318_s27 + $0xc] sm:$0x3] }
  0x36   : > { %v1654_v36 = vld [vmem:[%s2318_s27 + $0x1c] sm:$0x3]  ;;  %v721_v39 = vadd.f32 %v1655_v32, %v704_v31  ;;  %v922_v22 = vld [vmem:[%s2295_s9] sm:$0xff]  ;;  %v923_v23 = vld [vmem:[%s2295_s9 + $0x8] sm:$0xff] }
  0x37   : > { %v720_v47 = vadd.f32 %v1654_v36, %v703_v35  ;;  %v1072_v24 = vld [vmem:[%s2296_s10] sm:$0xff]  ;;  %v1789_v25 = vpack.c.bf16 %v923_v23, %v922_v22  ;;  %v1073_v26 = vld [vmem:[%s2296_s10 + $0x8] sm:$0xff] }
  0x39   : > { %1790 = vmatpush3.bf16.msra.mxu1 %v1789_v25 }
  0x3a   : > { %1729 = vmatprep.subr.mxu1 %v1882_v12 }
 0x107   : > { %v693_v37 = vpop.f32.mrb[0].mxu0 }
 0x108   : > { %v1721_v40 = vpop.f32.mrb[1].mxu0  ;;  %v724_v41 = vadd.f32 %v716_v27, %v693_v37  ;;  %v722_v42 = vadd.f32 %v714_v28, %v693_v37  ;;  %v725_v43 = vadd.f32 %v717_v29, %v693_v37  ;;  %v723_v44 = vadd.f32 %v715_v30, %v693_v37 }
 0x109   : > { %v727_v45 = vadd.f32 %v719_v33, %v693_v37  ;;  %v726_v46 = vadd.f32 %v718_v34, %v693_v37  ;;  %v729_v53 = vadd.f32 %v721_v39, %v693_v37  ;;  %v728_v55 = vadd.f32 %v720_v47, %v693_v37 }
 0x10a   : > { %v739_v48 = vadd.f32 %v1656_v38, %v724_v41  ;;  %v737_v49 = vadd.f32 %v1656_v38, %v722_v42  ;;  %v740_v50 = vadd.f32 %v1656_v38, %v725_v43  ;;  %v738_v51 = vadd.f32 %v1656_v38, %v723_v44 }
 0x10b   : > { %v742_v52 = vadd.f32 %v1656_v38, %v727_v45  ;;  %v741_v54 = vadd.f32 %v1656_v38, %v726_v46  ;;  %v744_v56 = vadd.f32 %v1656_v38, %v729_v53  ;;  %v743_v57 = vadd.f32 %v1656_v38, %v728_v55 }
 0x10c   : > { %1828 = vtanh.f32 %v739_v48  ;;  %v1792_v27 = vpack.c.bf16 %v1073_v26, %v1072_v24 }
 0x10d   : > { %1830 = vtanh.f32 %v737_v49 }
 0x10e   : > { %1832 = vtanh.f32 %v740_v50  ;;  %1793 = vmatpush3.bf16.msra.mxu0 %v1792_v27 }
 0x10f   : > { %1834 = vtanh.f32 %v738_v51  ;;  %1800 = vmatprep.subr.bf16.mxu0 %v1880_v9 }
 0x110   : > { %1836 = vtanh.f32 %v742_v52 }
 0x111   : > { %1838 = vtanh.f32 %v741_v54 }
 0x112   : > { %1840 = vtanh.f32 %v744_v56 }
 0x113   : > { %1842 = vtanh.f32 %v743_v57 }
 0x116   : > { %v1829_v59 = vpop.eup %1828 }
 0x117   : > { %v1831_v60 = vpop.eup %1830  ;;  %v762_v61 = vmul.f32 %v1829_v59, %v1657_v58 }
 0x118   : > { %v1833_v62 = vpop.eup %1832  ;;  %v760_v63 = vmul.f32 %v1831_v60, %v1657_v58 }
 0x119   : > { %v1835_v0 = vpop.eup %1834  ;;  %v775_v1 = vsel %vm768_vm3, %v762_v61, 0.0  ;;  %v763_v2 = vmul.f32 %v1833_v62, %v1657_v58 }
 0x11a   : > { %v1837_v3 = vpop.eup %1836  ;;  %776 = vadd.xlane.f32.xlu1 %v775_v1  ;;  %v769_v4 = vsel %vm768_vm3, %v760_v63, 0.0  ;;  %v761_v5 = vmul.f32 %v1835_v0, %v1657_v58 }
 0x11b   : > { %v1839_v6 = vpop.eup %1838  ;;  %770 = vadd.xlane.f32.xlu0 %v769_v4  ;;  %v778_v7 = vsel %vm768_vm3, %v763_v2, 0.0  ;;  %v765_v8 = vmul.f32 %v1837_v3, %v1657_v58 }
 0x11c   : > { %v1841_v10 = vpop.eup %1840  ;;  %v772_v11 = vsel %vm768_vm3, %v761_v5, 0.0  ;;  %v764_v13 = vmul.f32 %v1839_v6, %v1657_v58 }
 0x11d   : > { %v1843_v15 = vpop.eup %1842  ;;  %v784_v16 = vsel %vm768_vm3, %v765_v8, 0.0  ;;  %v767_v17 = vmul.f32 %v1841_v10, %v1657_v58 }
 0x11e   : > { %779 = vadd.xlane.f32.xlu1 %v778_v7  ;;  %v781_v18 = vsel %vm768_vm3, %v764_v13, 0.0  ;;  %v766_v19 = vmul.f32 %v1843_v15, %v1657_v58 }
 0x11f   : > { %773 = vadd.xlane.f32.xlu0 %v772_v11  ;;  %v790_v20 = vsel %vm768_vm3, %v767_v17, 0.0 }
 0x120   : > { %v787_v21 = vsel %vm768_vm3, %v766_v19, 0.0 }
 0x122   : > { %785 = vadd.xlane.f32.xlu1 %v784_v16 }
 0x123   : > { %782 = vadd.xlane.f32.xlu0 %v781_v18 }
 0x126   : > { %791 = vadd.xlane.f32.xlu1 %v790_v20 }
 0x127   : > { %788 = vadd.xlane.f32.xlu0 %v787_v21 }
 0x1a7   : > { %v777_v28 = vpop.xlane.xlu1 %776 }
 0x1a8   : > { %v771_v29 = vpop.xlane.xlu0 %770  ;;  %v796_v44 = vsel %vm793_vm4, %v777_v28, -inf }
 0x1a9   : > { %v794_v36 = vsel %vm793_vm4, %v771_v29, -inf }
 0x1ab   : > { %v780_v30 = vpop.xlane.xlu1 %779 }
 0x1ac   : > { %v774_v31 = vpop.xlane.xlu0 %773  ;;  %v797_v39 = vsel %vm793_vm4, %v780_v30, -inf }
 0x1ad   : > { %v795_v37 = vsel %vm793_vm4, %v774_v31, -inf }
 0x1af   : > { %v786_v32 = vpop.xlane.xlu1 %785 }
 0x1b0   : > { %v783_v33 = vpop.xlane.xlu0 %782  ;;  %v800_v34 = vsel %vm793_vm4, %v786_v32, -inf }
 0x1b1   : > { %v798_v35 = vsel %vm793_vm4, %v783_v33, -inf  ;;  %v801_v40 = vmax.f32 %v795_v37, %v800_v34  ;;  %v860_v37 = vld [vmem:[%s2319_s18 + $0x6] sm:$0x3] }
 0x1b2   : > { %v799_v41 = vmax.f32 %v794_v36, %v798_v35 }
 0x1b3   : > { %v792_v38 = vpop.xlane.xlu1 %791 }
 0x1b4   : > { %v804_v42 = vsel %vm793_vm4, %v792_v38, -inf  ;;  %v789_v43 = vpop.xlane.xlu0 %788  ;;  %v806_v48 = vmax.f32 %v799_v41, %v801_v40 }
 0x1b5   : > { %v805_v45 = vmax.f32 %v797_v39, %v804_v42  ;;  %v802_v46 = vsel %vm793_vm4, %v789_v43, -inf }
 0x1b6   : > { %v803_v47 = vmax.f32 %v796_v44, %v802_v46  ;;  %v1658_v44 = vld [vmem:[%s2319_s18 + $0x10] sm:$0x3]  ;;  %v862_v46 = vld [vmem:[%s2319_s18 + $0xa] sm:$0x3] }
 0x1b8   : > { %v807_v49 = vmax.f32 %v803_v47, %v805_v45  ;;  %v1659_v45 = vld [vmem:[%s2319_s18 + $0x12] sm:$0x3] }
 0x1ba   : > { %v808_v50 = vmax.f32 %v806_v48, %v807_v49 }
 0x1bc   : > { %v809_v51 = vsub.f32 %v771_v29, %v808_v50  ;;  %v810_v52 = vsub.f32 %v774_v31, %v808_v50  ;;  %v811_v53 = vsub.f32 %v777_v28, %v808_v50  ;;  %v812_v54 = vsub.f32 %v780_v30, %v808_v50  ;;  %v857_v30 = vld [vmem:[%s2319_s18] sm:$0x3]  ;;  %v858_v31 = vld [vmem:[%s2319_s18 + $0x2] sm:$0x3] }
 0x1bd   : > { %v813_v55 = vsub.f32 %v783_v33, %v808_v50  ;;  %v814_v59 = vsub.f32 %v786_v32, %v808_v50  ;;  %v815_v61 = vsub.f32 %v789_v43, %v808_v50  ;;  %v816_v63 = vsub.f32 %v792_v38, %v808_v50  ;;  %v859_v32 = vld [vmem:[%s2319_s18 + $0x4] sm:$0x3]  ;;  %v861_v43 = vld [vmem:[%s2319_s18 + $0x8] sm:$0x3]  ;;  %v1660_v50 = vld [vmem:[%s2319_s18 + $0x14] sm:$0x3] }
 0x1be   : > { %v817_v56 = vmul.f32 1.442695, %v809_v51  ;;  %v819_v57 = vmul.f32 1.442695, %v810_v52  ;;  %v821_v58 = vmul.f32 1.442695, %v811_v53 }
 0x1bf   : > { %v823_v60 = vmul.f32 1.442695, %v812_v54  ;;  %v825_v62 = vmul.f32 1.442695, %v813_v55  ;;  %v827_v0 = vmul.f32 1.442695, %v814_v59 }
 0x1c0   : > { %1844 = vpow2.f32 %v817_v56  ;;  %v829_v1 = vmul.f32 1.442695, %v815_v61  ;;  %v831_v2 = vmul.f32 1.442695, %v816_v63  ;;  %v1661_v53 = vld [vmem:[%s2319_s18 + $0x16] sm:$0x3] }
 0x1c1   : > { %1846 = vpow2.f32 %v819_v57  ;;  %v863_v59 = vld [vmem:[%s2319_s18 + $0xc] sm:$0x3] }
 0x1c2   : > { %1848 = vpow2.f32 %v821_v58 }
 0x1c3   : > { %1850 = vpow2.f32 %v823_v60 }
 0x1c4   : > { %1852 = vpow2.f32 %v825_v62  ;;  %v1662_v62 = vld [vmem:[%s2319_s18 + $0x18] sm:$0x3] }
 0x1c5   : > { %1854 = vpow2.f32 %v827_v0 }
 0x1c6   : > { %1856 = vpow2.f32 %v829_v1 }
 0x1c7   : > { %1858 = vpow2.f32 %v831_v2 }
 0x1ca   : > { %v1845_v3 = vpop.eup %1844 }
 0x1cb   : > { %v1847_v4 = vpop.eup %1846  ;;  %v833_v5 = vsel %vm793_vm4, %v1845_v3, 0.0 }
 0x1cc   : > { %v1849_v6 = vpop.eup %1848  ;;  %v834_v7 = vsel %vm793_vm4, %v1847_v4, 0.0 }
 0x1cd   : > { %v1851_v8 = vpop.eup %1850  ;;  %v835_v10 = vadd.f32 %v834_v7, %v833_v5  ;;  %v836_v11 = vsel %vm793_vm4, %v1849_v6, 0.0 }
 0x1ce   : > { %v1853_v13 = vpop.eup %1852  ;;  %v838_v16 = vsel %vm793_vm4, %v1851_v8, 0.0 }
 0x1cf   : > { %v837_v15 = vadd.f32 %v836_v11, %v835_v10  ;;  %v1855_v17 = vpop.eup %1854  ;;  %v840_v19 = vsel %vm793_vm4, %v1853_v13, 0.0 }
 0x1d0   : > { %v1857_v20 = vpop.eup %1856  ;;  %v842_v22 = vsel %vm793_vm4, %v1855_v17, 0.0 }
 0x1d1   : > { %v839_v18 = vadd.f32 %v838_v16, %v837_v15  ;;  %v1859_v23 = vpop.eup %1858  ;;  %v844_v25 = vsel %vm793_vm4, %v1857_v20, 0.0  ;;  %v1664_v15 = vld [vmem:[%s2319_s18 + $0x1c] sm:$0x3] }
 0x1d2   : > { %v846_v27 = vsel %vm793_vm4, %v1859_v23, 0.0 }
 0x1d3   : > { %v841_v21 = vadd.f32 %v840_v19, %v839_v18 }
 0x1d5   : > { %v843_v24 = vadd.f32 %v842_v22, %v841_v21 }
 0x1d7   : > { %v845_v26 = vadd.f32 %v844_v25, %v843_v24 }
 0x1d9   : > { %v847_v28 = vadd.f32 %v846_v27, %v845_v26 }
 0x1db   : > { %1860 = vrcp.f32 %v847_v28 }
 0x1e5   : > { %v1861_v29 = vpop.eup %1860 }
 0x1e6   : > { %v849_v33 = vmul.f32 %v1861_v29, %v1845_v3  ;;  %v850_v34 = vmul.f32 %v1861_v29, %v1847_v4  ;;  %v851_v35 = vmul.f32 %v1861_v29, %v1849_v6  ;;  %v852_v36 = vmul.f32 %v1861_v29, %v1851_v8  ;;  %v864_v4 = vld [vmem:[%s2319_s18 + $0xe] sm:$0x3]  ;;  %v1663_v6 = vld [vmem:[%s2319_s18 + $0x1a] sm:$0x3] }
 0x1e7   : > { %v853_v38 = vmul.f32 %v1861_v29, %v1853_v13  ;;  %v854_v42 = vmul.f32 %v1861_v29, %v1855_v17  ;;  %v855_v51 = vmul.f32 %v1861_v29, %v1857_v20  ;;  %v856_v58 = vmul.f32 %v1861_v29, %v1859_v23  ;;  %v1665_v23 = vld [vmem:[%s2319_s18 + $0x1e] sm:$0x3] }
 0x1e8   : > { %v865_v39 = vmul.f32 %v857_v30, %v849_v33  ;;  %v866_v40 = vmul.f32 %v858_v31, %v850_v34  ;;  %v867_v41 = vmul.f32 %v859_v32, %v851_v35  ;;  %v868_v47 = vmul.f32 %v860_v37, %v852_v36  ;;  %v1276_v37 = vld [vmem:[%s2301_s15 + $0x8] sm:$0xff] }
 0x1e9   : > { %v869_v54 = vmul.f32 %v861_v43, %v853_v38  ;;  %v898_v56 = vmul.f32 %v1658_v44, %v849_v33  ;;  %v899_v57 = vmul.f32 %v1659_v45, %v850_v34  ;;  %v870_v60 = vmul.f32 %v862_v46, %v854_v42  ;;  %v921_v34 = vld [vmem:[%s2294_s8] sm:$0xff] }
 0x1ea   : > { %v874_v48 = vsel %vm873_vm5, %v865_v39, 0.0  ;;  %v875_v49 = vsel %vm873_vm5, %v866_v40, 0.0  ;;  %v877_v55 = vsel %vm873_vm5, %v867_v41, 0.0  ;;  %v900_v63 = vmul.f32 %v1660_v50, %v851_v35  ;;  %v1156_v39 = vld [vmem:[%s2297_s11] sm:$0xff]  ;;  %v1157_v40 = vld [vmem:[%s2297_s11 + $0x8] sm:$0xff] }
 0x1eb   : > { %v876_v52 = vadd.f32 %v875_v49, %v874_v48  ;;  %v879_v0 = vsel %vm873_vm5, %v868_v47, 0.0  ;;  %v901_v1 = vmul.f32 %v1661_v53, %v852_v36  ;;  %v906_v2 = vsel %vm873_vm5, %v898_v56, 0.0  ;;  %v1275_v36 = vld [vmem:[%s2301_s15] sm:$0xff]  ;;  %v1158_v47 = vld [vmem:[%s2297_s11 + $0x10] sm:$0xff]  ;;  %v1159_v48 = vld [vmem:[%s2297_s11 + $0x18] sm:$0xff] }
 0x1ec   : > { %v907_v3 = vsel %vm873_vm5, %v899_v57, 0.0  ;;  %v871_v8 = vmul.f32 %v863_v59, %v855_v51  ;;  %v881_v10 = vsel %vm873_vm5, %v869_v54, 0.0  ;;  %v902_v11 = vmul.f32 %v1662_v62, %v853_v38  ;;  %v2214_v44 = vld [vmem:[%s1997_s23] sm:$0x3] }
 0x1ed   : > { %v878_v61 = vadd.f32 %v877_v55, %v876_v52  ;;  %v908_v7 = vadd.f32 %v907_v3, %v906_v2  ;;  %v909_v13 = vsel %vm873_vm5, %v900_v63, 0.0  ;;  %v872_v18 = vmul.f32 %v864_v4, %v856_v58  ;;  %v1419_v50 = vld [vmem:[%s2302_s16] sm:$0xff] }
 0x1ee   : > { %v883_v19 = vsel %vm873_vm5, %v870_v60, 0.0  ;;  %v903_v20 = vmul.f32 %v1663_v6, %v854_v42  ;;  %v911_v21 = vsel %vm873_vm5, %v901_v1, 0.0  ;;  %v904_v25 = vmul.f32 %v1664_v15, %v855_v51  ;;  %v1420_v51 = vld [vmem:[%s2302_s16 + $0x8] sm:$0xff]  ;;  %v1670_v63 = vld [vmem:[%s2299_s13] ss:$0 sm:$0xff] }
 0x1ef   : > { %v880_v5 = vadd.f32 %v879_v0, %v878_v61  ;;  %v910_v17 = vadd.f32 %v909_v13, %v908_v7  ;;  %v885_v26 = vsel %vm873_vm5, %v871_v8, 0.0  ;;  %v913_v27 = vsel %vm873_vm5, %v902_v11, 0.0  ;;  %v1669_v4 = vld [vmem:[%s2298_s12] ss:$0 sm:$0xff] }
 0x1f0   : > { %v887_v30 = vsel %vm873_vm5, %v872_v18, 0.0  ;;  %v905_v31 = vmul.f32 %v1665_v23, %v856_v58  ;;  %v915_v32 = vsel %vm873_vm5, %v903_v20, 0.0  ;;  %v917_v38 = vsel %vm873_vm5, %v904_v25, 0.0  ;;  %v1271_v18 = vld [vmem:[%s2300_s14] sm:$0xff]  ;;  %v1273_v20 = vld [vmem:[%s2300_s14 + $0x10] sm:$0xff] }
 0x1f1   : > { %v882_v16 = vadd.f32 %v881_v10, %v880_v5  ;;  %v912_v24 = vadd.f32 %v911_v21, %v910_v17  ;;  %v1801_v43 = vpack.c.bf16 %v1276_v37, %v1275_v36  ;;  %v1795_v46 = vpack.c.bf16 %v1157_v40, %v1156_v39  ;;  %v1492_v25 = vld [vmem:[%s2303_s17] sm:$0xff] }
 0x1f2   : > { %v919_v42 = vsel %vm873_vm5, %v905_v31, 0.0  ;;  %v1798_v49 = vpack.c.bf16 %v1159_v48, %v1158_v47  ;;  %v1810_v52 = vpack.c.bf16 %v1420_v51, %v1419_v50  ;;  %v1677_v37 = vld [vmem:[%s2320_s2] ss:$0 sm:$0xff] }
 0x1f3   : > { %v884_v22 = vadd.f32 %v883_v19, %v882_v16  ;;  %v914_v29 = vadd.f32 %v913_v27, %v912_v24  ;;  %v1272_v19 = vld [vmem:[%s2300_s14 + $0x8] sm:$0xff] }
 0x1f4   : > { %v1804_v21 = vpack.c.bf16 %v1272_v19, %v1271_v18 }
 0x1f5   : > { %v886_v28 = vadd.f32 %v885_v26, %v884_v22  ;;  %v916_v35 = vadd.f32 %v915_v32, %v914_v29  ;;  %v1274_v22 = vld [vmem:[%s2300_s14 + $0x18] sm:$0xff] }
 0x1f6   : > { %v1807_v23 = vpack.c.bf16 %v1274_v22, %v1273_v20 }
 0x1f7   : > { %v888_v33 = vadd.f32 %v887_v30, %v886_v28  ;;  %v918_v41 = vadd.f32 %v917_v38, %v916_v35 }
 0x1f9   : > { %1727 = vmatmul.mubr.msk.f32.vlgmr.msra.gmra.mrb[0].mxu1 %vm924_vm6, %v888_v33  ;;  %v920_v45 = vadd.f32 %v919_v42, %v918_v41 }
 0x1fa   : > { %1730 = vmatpush3.msra.mxu1 %v921_v34  ;;  %1731 = vmatprep.mubr.msk.f32.mxu1 %vm1881_vm1, %v1882_v12 }
 0x1fb   : > { %1794 = vmatprep.subr.bf16.mxu1 %v1880_v9  ;;  %1739 = vmatmul.mubr.msk.f32.vlgmr.msra.gmra.mrb[2].mxu0 %vm924_vm6, %v920_v45 }
 0x1fc   : > { %1802 = vmatpush3.bf16.msra.mxu0 %v1801_v43  ;;  %1756 = vmatprep.mubr.msk.f32.mxu0 %vm1881_vm1, %v1882_v12 }
 0x1fd   : > { %1732 = vmatmul.mubr.msk.f32.vlgmr.msra.gmra.mrb[2].mxu1 %vm998_vm7, %v2214_v44  ;;  %1803 = vmatprep.subr.bf16.mxu0 %v1880_v9 }
 0x1fe   : > { %1796 = vmatpush3.bf16.msra.mxu1 %v1795_v46  ;;  %1749 = vmatprep.mubr.msk.f32.mxu1 %vm1881_vm1, %v1882_v12 }
 0x1ff   : > { %1797 = vmatprep.subr.bf16.mxu1 %v1880_v9  ;;  %1757 = vmatmul.mubr.msk.f32.vlgmr.msra.gmra.mrb[4].mxu0 %vm924_vm6, %v888_v33 }
 0x200   : > { %1767 = vmatprep.mubr.msk.f32.mxu0 %vm1881_vm1, %v1882_v12  ;;  %1805 = vmatpush3.bf16.msra.mxu0 %v1804_v21 }
 0x201   : > { %1806 = vmatprep.subr.bf16.mxu0 %v1880_v9 }
 0x202   : > { %1799 = vmatpush3.bf16.msra.mxu1 %v1798_v49 }
 0x203   : > { %1809 = vmatprep.subr.bf16.mxu1 %v1880_v9 }
 0x204   : > { %1808 = vmatpush3.bf16.msra.mxu0 %v1807_v23 }
 0x205   : > { %1750 = vmatmul.mubr.msk.f32.vlgmr.msra.gmra.mrb[4].mxu1 %vm623_vm2, %v2032_v14 }
 0x206   : > { %1811 = vmatpush3.bf16.msra.mxu1 %v1810_v52  ;;  %1774 = vmatprep.mubr.msk.f32.mxu1 %vm1881_vm1, %v1882_v12 }
 0x207   : > { %1777 = vmatprep.subr.mxu1 %v1882_v12 }
 0x209   : > { %1775 = vmatmul.mubr.msk.f32.vlgmr.msra.gmra.mrb[6].mxu1 %vm924_vm6, %v920_v45 }
 0x20a   : > { %1779 = vmatprep.mubr.msk.f32.mxu1 %vm1881_vm1, %v1882_v12  ;;  %1778 = vmatpush3.msra.mxu1 %v1492_v25 }
 0x20d   : > { %1780 = vmatmul.mubr.msk.f32.vlgmr.msra.gmra.mrb[8].mxu1 %vm998_vm7, %v2214_v44 }
 0x2cc   : > { %v994_v53 = vpop.f32.mrb[0].mxu1 }
 0x2cd   : > { %v1728_v54 = vpop.f32.mrb[1].mxu1 }
 0x2ce   : > { %v1143_v55 = vpop.f32.mrb[2].mxu0 }
 0x2cf   : > { %v1740_v57 = vpop.f32.mrb[3].mxu0 }
 0x2d0   : > { %v1068_v56 = vpop.f32.mrb[2].mxu1 }
 0x2d1   : > { %v1069_v58 = vadd.f32 %v1068_v56, %v994_v53  ;;  %v1733_v59 = vpop.f32.mrb[3].mxu1 }
 0x2d2   : > { %v1343_v61 = vpop.f32.mrb[4].mxu0 }
 0x2d3   : > { %v1147_v60 = vadd.f32 %v1143_v55, %v1069_v58  ;;  %v1758_v62 = vpop.f32.mrb[5].mxu0 }
 0x2d5   : > { %v1155_v5 = vadd.f32 %v1669_v4, %v1147_v60 }
 0x2d8   : > { %v1233_v0 = vpop.f32.mrb[4].mxu1 }
 0x2d9   : > { %v1234_v1 = vadd.f32 %v1670_v63, %v1233_v0  ;;  %v1751_v2 = vpop.f32.mrb[5].mxu1 }
 0x2db   : > { %1245 = vrot.lane.b32.xlu0 %v1234_v1, %s1883_s30  ;;  %v1237_v6 = vadd.f32 %v1234_v1, %v1155_v5 }
 0x2dc   : > { %v1487_v12 = vpop.f32.mrb[6].mxu1 }
 0x2dd   : > { %v1776_v3 = vpop.f32.mrb[7].mxu1  ;;  %v1672_v7 = vmul.f32 -1.442695, %v1237_v6 }
 0x2df   : > { %1862 = vpow2.f32 %v1672_v7 }
 0x2e9   : > { %v1863_v8 = vpop.eup %1862 }
 0x2ea   : > { %v1241_v10 = vadd.f32 1.0, %v1863_v8 }
 0x2ec   : > { %1864 = vrcp.f32 %v1241_v10 }
 0x2f6   : > { %v1865_v11 = vpop.eup %1864 }
 0x2f7   : > { %v1255_v27 = vsub.f32 1.0, %v1865_v11 }
 0x34d   : > { %v1246_v13 = vpop.permute.xlu0 %1245 }
 0x34e   : > { %v1248_v15 = vmul.f32 %v1865_v11, %v1246_v13 }
 0x350   : > { %1250 = vrot.lane.b32.xlu1 %v1248_v15, %s1883_s30  ;;  %s1885_s30 = smov 32  }
 0x3c2   : > { %v1251_v16 = vpop.permute.xlu1 %1250 }
 0x3c3   : > { %v1253_v17 = vadd.f32 %v1251_v16, %v1155_v5 }
 0x3c5   : > { %1866 = vtanh.f32 %v1253_v17 }
 0x3cf   : > { %v1867_v24 = vpop.eup %1866 }
 0x3d0   : > { %1257 = vrot.lane.b32.xlu1 %v1867_v24, %s1884_s20 }
 0x3d4   : > { %1261 = vrot.lane.b32.xlu1 %v2032_v14, %s1885_s30  ;;  %v1559_v14 = vpop.f32.mrb[8].mxu1 }
 0x3d5   : > { %v1781_v32 = vpop.f32.mrb[9].mxu1 }
 0x442   : > { %v1258_v26 = vpop.permute.xlu1 %1257 }
 0x443   : > { %v1260_v29 = vmul.f32 %v1258_v26, %v1255_v27 }
 0x446   : > { %v1262_v28 = vpop.permute.xlu1 %1261 }
 0x447   : > { %v1264_v30 = vmul.f32 %v1865_v11, %v1262_v28 }
 0x449   : > { %v1265_v9 = vadd.f32 %v1264_v30, %v1260_v29 }
 0x44b   : > { %1267 = vrot.lane.b32.xlu0 %v1265_v9, %s1884_s20 }
 0x4bd   : > { %v1268_v31 = vpop.permute.xlu0 %1267 }
 0x4be   : > { %1270 = vst.msk [vmem:[#allocation2] sm:$0x3] %vm768_vm3, %v1268_v31  ;;  %1768 = vmatmul.mubr.msk.f32.vlgmr.msra.gmra.mrb[6].mxu0 %vm623_vm2, %v1268_v31 }
 0x591   : > { %v1415_v33 = vpop.f32.mrb[6].mxu0 }
 0x592   : > { %v1416_v34 = vadd.f32 %v1415_v33, %v1343_v61  ;;  %v1769_v35 = vpop.f32.mrb[7].mxu0 }
 0x594   : > { %v1491_v36 = vadd.f32 %v1487_v12, %v1416_v34 }
 0x596   : > { %v1563_v38 = vadd.f32 %v1559_v14, %v1491_v36 }
 0x598   : > { %v1571_v39 = vadd.f32 %v1677_v37, %v1563_v38 }
 0x59a   : > { %v1572_v40 = vsel %vm793_vm4, %v1571_v39, -inf }
 0x59b   : > { %1573 = vmax.xlane.f32.xlu1 %v1572_v40 }
 0x628   : > { %v1574_v41 = vpop.xlane.xlu1 %1573 }
 0x629   : > { %v1575_v42 = vsub.f32 %v1571_v39, %v1574_v41 }
 0x62b   : > { %v1576_v43 = vmul.f32 1.442695, %v1575_v42 }
 0x62d   : > { %1868 = vpow2.f32 %v1576_v43 }
 0x637   : > { %v1869_v44 = vpop.eup %1868 }
 0x638   : > { %v1578_v45 = vsel %vm793_vm4, %v1869_v44, 0.0 }
 0x639   : > { %1579 = vadd.xlane.f32.xlu0 %v1578_v45 }
 0x6c6   : > { %v1580_v46 = vpop.xlane.xlu0 %1579 }
 0x6c7   : > { %1870 = vrcp.f32 %v1580_v46 }
 0x6d1   : > { %v1871_v47 = vpop.eup %1870 }
 0x6d2   : > { %v1582_v48 = vmul.f32 %v1871_v47, %v1869_v44 }
 0x6d4   : > { %1583 = vst [vmem:[%s2002_s3] sm:$0x3] %v1582_v48 }
 0x6d5 PF: > { %s2321_s23 = sld [smem:[#allocation3_spill]] }
 0x6db   : > { %s29_s0 = sadd.s32 1, %s2321_s23  }
 0x6dc   : > { %p26_p5 = scmp.ge.s32.totalorder %s29_s0, 8  }
 0x6de   :  { %28 = sbr.rel (!%p26_p5) target bundleno = 6 (0x6), region = 133 }

</bundles_post_ra>
